<compile_context>
chip_gen: v7x
topology: tpu7x:2x2x1
jax: 0.10.0
libtpu: 0.0.40
codegen_flags: <defaults>
</compile_context>

<pallas_src>
import jax
import jax.numpy as jnp
from jax.experimental import pallas as pl
from jax.experimental.pallas import tpu as pltpu

ENC_DIMS = [44, 37, 31, 26, 22]
DEC_DIMS = [22, 26, 31, 37, 44]
N_LAYERS = 8                       # 4 encoder + 4 decoder
RELU_LAYERS = (0, 1, 2, 4, 5, 6)   # no ReLU after encoder-out (3) / decoder-out (7)
ENC_LAYER = 3

F_IN = ENC_DIMS[0]                 # 44 input features
LANES = 128                        # lane-padded feature width
SLAB = 128                         # rows per packed weight slab
PACK_ROWS = SLAB * N_LAYERS        # 1024 rows (bias folded into row 127 of each slab)
DEC_COL_OFF = ENC_DIMS[-1]         # decoder output packed at lanes 22:66
BIAS_LANE = LANES - 1              # ones-lane that carries the bias through the MXU
TB_MAX = 2048                      # big tiles amortize grid overhead; still tiny vs VMEM


def _round_up(n, m):
    return ((n + m - 1) // m) * m


def _pick_tb(b):
    """>=4 grid steps when possible (>=2 per v7x TensorCore), capped at TB_MAX."""
    return min(TB_MAX, _round_up(max(1, pl.cdiv(b, 4)), 8))


def autoencoder_kernel(x_ref, p_ref, out_ref, h_ref):
    """x_ref: (tb, 44) raw input tile.
    p_ref: (1024, 128) packed params (weights + bias row 127 per 128x128 slab).
    out_ref: (tb, 128) fused output (enc in lanes 0:22, dec in lanes 22:66).
    h_ref: (tb, 128) scratch used to lane-pad the input in VMEM."""
    tb = x_ref.shape[0]
    lane = jax.lax.broadcasted_iota(jnp.int32, (tb, LANES), 1)
    # zeros everywhere except 1.0 in the bias passthrough lane (127)
    h_ref[...] = (lane == BIAS_LANE).astype(h_ref.dtype)
    h_ref[:, :F_IN] = x_ref[...]
    h = h_ref[...]

    enc = None
    for i in range(N_LAYERS):
        w = p_ref[SLAB * i:SLAB * (i + 1), :]                 # (128, 128) zero-padded
        h = jnp.dot(h, w, preferred_element_type=jnp.float32)  # bias rides in via lane 127
        if i in RELU_LAYERS:
            h = jnp.maximum(h, 0.0)
        h = h.astype(h_ref.dtype)
        if i == ENC_LAYER:
            enc = h                                            # lanes 0:22 nonzero

    # decoded `h` occupies lanes 22:66 (last layer packed at column offset 22);
    # it never overlaps with `enc`, so a plain add fuses both into one slab.
    out_ref[...] = (enc + h).astype(out_ref.dtype)


def init_params(key):
    """Deterministic init mimicking nn.Linear's U(-1/sqrt(in), 1/sqrt(in)).

    Weights are stored transposed as (in, out); biases as (out,)."""
    dims = list(zip(ENC_DIMS[:-1], ENC_DIMS[1:])) + list(
        zip(DEC_DIMS[:-1], DEC_DIMS[1:])
    )
    params = []
    for (d_in, d_out) in dims:
        key, kw, kb = jax.random.split(key, 3)
        bound = 1.0 / jnp.sqrt(jnp.float32(d_in))
        w = jax.random.uniform(kw, (d_in, d_out), jnp.float32, -bound, bound)
        b = jax.random.uniform(kb, (d_out,), jnp.float32, -bound, bound)
        params.append((w, b))
    return params


def pack_params(params, dtype=jnp.bfloat16):
    """Pack weights + biases into one lane-padded (1024, 128) slab.

    Layer i occupies rows 128*i : 128*i+128.  Its bias sits in row 127 of the
    slab and w[127,127] = 1.0 so the ones-lane propagates through all layers."""
    packed = jnp.zeros((PACK_ROWS, LANES), jnp.float32)
    for i, (w, b) in enumerate(params):
        d_in, d_out = w.shape
        col = DEC_COL_OFF if i == N_LAYERS - 1 else 0
        r0 = SLAB * i
        packed = packed.at[r0:r0 + d_in, col:col + d_out].set(w)
        packed = packed.at[r0 + SLAB - 1, col:col + d_out].set(b)   # bias row
        packed = packed.at[r0 + SLAB - 1, BIAS_LANE].set(1.0)       # ones-lane passthrough
    return packed.astype(dtype)


def autoencoder_forward(x, params, *, tb=None, compute_dtype=jnp.bfloat16):
    B, F = x.shape
    assert F == F_IN
    packed = pack_params(params, compute_dtype)

    if tb is None:
        tb = _pick_tb(B)
    tb = max(8, _round_up(tb, 8))
    b_pad = _round_up(B, tb)

    x_c = x.astype(compute_dtype)
    if b_pad != B:
        # rows-only pad (no lane inflation); lane padding happens in-kernel.
        x_c = jnp.pad(x_c, ((0, b_pad - B), (0, 0)))

    def run(params_spec):
        return pl.pallas_call(
            autoencoder_kernel,
            out_shape=jax.ShapeDtypeStruct((b_pad, LANES), compute_dtype),
            grid=(b_pad // tb,),
            in_specs=[
                pl.BlockSpec((tb, F_IN), lambda i: (i, 0)),   # x tile (full 44-lane dim)
                params_spec,                                  # params: VMEM-resident
            ],
            out_specs=pl.BlockSpec((tb, LANES), lambda i: (i, 0)),
            scratch_shapes=[pltpu.VMEM((tb, LANES), compute_dtype)],
            compiler_params=pltpu.CompilerParams(
                dimension_semantics=("parallel",),
                vmem_limit_bytes=32 * 1024 * 1024),
        )(x_c, packed)

    try:
        # single-buffer the constant params slab (never re-fetched)
        out = run(pl.BlockSpec((PACK_ROWS, LANES), lambda i: (0, 0),
                               pipeline_mode=pl.Buffered(1)))
    except Exception:
        # fallback if pipeline_mode on a top-level BlockSpec is unsupported here
        out = run(pl.BlockSpec((PACK_ROWS, LANES), lambda i: (0, 0)))

    encoded = out[:B, :ENC_DIMS[-1]].astype(x.dtype)
    decoded = out[:B, DEC_COL_OFF:DEC_COL_OFF + DEC_DIMS[-1]].astype(x.dtype)
    return encoded, decoded


def autoencoder_ref(x, params):
    """Pure-JAX reference of the PyTorch forward."""
    h = x
    for li, (w, b) in enumerate(params[:4]):
        h = h @ w + b
        if li < 3:
            h = jnp.maximum(h, 0.0)
    enc = h
    for li, (w, b) in enumerate(params[4:]):
        h = h @ w + b
        if li < 3:
            h = jnp.maximum(h, 0.0)
    return enc, h


if __name__ == "__main__":
    key = jax.random.PRNGKey(0)
    key, kx = jax.random.split(key)
    params = init_params(key)

    # (B, dtype, tol): f32 path for tight correctness, bf16 path = perf default.
    cases = (
        (8, jnp.float32, 2e-5),
        (256, jnp.bfloat16, 5e-2),
    )
    for B, dtype, tol in cases:
        kx, kb = jax.random.split(kx)
        x = jax.random.normal(kb, (B, ENC_DIMS[0]), jnp.float32)

        encoded, decoded = autoencoder_forward(x, params, compute_dtype=dtype)
        jax.block_until_ready((encoded, decoded))

        enc_ref, dec_ref = autoencoder_ref(x, params)
        assert encoded.shape == (B, ENC_DIMS[-1])
        assert decoded.shape == (B, DEC_DIMS[-1])
        assert jnp.allclose(encoded, enc_ref, atol=tol, rtol=tol), dtype
        assert jnp.allclose(decoded, dec_ref, atol=tol, rtol=tol), dtype

    print("KERNEL_OK")
</pallas_src>

<mosaic_0001>
module attributes {stable_mosaic.version = 11 : i64} {
  func.func @autoencoder_kernel(%arg0: i32, %arg1: memref<8x44xf32, #tpu.memory_space<vmem>>, %arg2: memref<1024x128xf32, #tpu.memory_space<vmem>>, %arg3: memref<8x128xf32, #tpu.memory_space<vmem>>, %arg4: memref<8x128xf32, #tpu.memory_space<vmem>>) attributes {dimension_semantics = [#tpu.dimension_semantics<parallel>], iteration_bounds = array<i64: 1>, scalar_prefetch = 0 : i64, scratch_operands = 1 : i64, tpu.core_type = #tpu.core_type<tc>, window_params = [{transform_indices = @transform_0, window_bounds = array<i64: 8, 44>}, {pipeline_mode = #tpu.pipeline_mode<synchronous>, transform_indices = @transform_1, window_bounds = array<i64: 1024, 128>}, {transform_indices = @transform_2, window_bounds = array<i64: 8, 128>}]} {
    %0 = tpu.iota {dimensions = array<i32: 1>} : vector<8x128xi32>
    %c127_i32 = arith.constant 127 : i32
    %1 = vector.broadcast %c127_i32 : i32 to vector<8x128xi32>
    %2 = arith.cmpi eq, %0, %1 : vector<8x128xi32>
    %3 = arith.extui %2 : vector<8x128xi1> to vector<8x128xi32>
    %4 = arith.sitofp %3 : vector<8x128xi32> to vector<8x128xf32>
    %c0 = arith.constant 0 : index
    %c0_0 = arith.constant 0 : index
    %5 = vector.load %arg4[%c0, %c0_0] : memref<8x128xf32, #tpu.memory_space<vmem>>, vector<8x128xf32>
    tpu.vector_store %arg4[%c0, %c0_0], %4 {strides = array<i32>} : memref<8x128xf32, #tpu.memory_space<vmem>>, vector<8x128xf32>,
    %c0_1 = arith.constant 0 : index
    %c0_2 = arith.constant 0 : index
    %6 = vector.load %arg1[%c0_1, %c0_2] : memref<8x44xf32, #tpu.memory_space<vmem>>, vector<8x44xf32>
    %c0_3 = arith.constant 0 : index
    %c0_4 = arith.constant 0 : index
    %7 = vector.load %arg4[%c0_3, %c0_4] : memref<8x128xf32, #tpu.memory_space<vmem>>, vector<8x44xf32>
    tpu.vector_store %arg4[%c0_3, %c0_4], %6 {strides = array<i32>} : memref<8x128xf32, #tpu.memory_space<vmem>>, vector<8x44xf32>,
    %c0_5 = arith.constant 0 : index
    %c0_6 = arith.constant 0 : index
    %8 = vector.load %arg4[%c0_5, %c0_6] : memref<8x128xf32, #tpu.memory_space<vmem>>, vector<8x128xf32>
    %c0_7 = arith.constant 0 : index
    %c0_8 = arith.constant 0 : index
    %9 = vector.load %arg2[%c0_7, %c0_8] : memref<1024x128xf32, #tpu.memory_space<vmem>>, vector<128x128xf32>
    %cst = arith.constant dense<0.000000e+00> : vector<8x128xf32>
    %10 = tpu.matmul %8, %9, %cst {dimension_numbers = #tpu.dot_dimension_numbers<[1], [0], [0], [1], [0, 0, 1, 1], [], []>} : vector<8x128xf32>, vector<128x128xf32>, vector<8x128xf32> -> vector<8x128xf32>
    %cst_9 = arith.constant 0.000000e+00 : f32
    %11 = vector.broadcast %cst_9 : f32 to vector<8x128xf32>
    %12 = arith.maximumf %10, %11 : vector<8x128xf32>
    %c128 = arith.constant 128 : index
    %c0_10 = arith.constant 0 : index
    %13 = vector.load %arg2[%c128, %c0_10] : memref<1024x128xf32, #tpu.memory_space<vmem>>, vector<128x128xf32>
    %cst_11 = arith.constant dense<0.000000e+00> : vector<8x128xf32>
    %14 = tpu.matmul %12, %13, %cst_11 {dimension_numbers = #tpu.dot_dimension_numbers<[1], [0], [0], [1], [0, 0, 1, 1], [], []>} : vector<8x128xf32>, vector<128x128xf32>, vector<8x128xf32> -> vector<8x128xf32>
    %cst_12 = arith.constant 0.000000e+00 : f32
    %15 = vector.broadcast %cst_12 : f32 to vector<8x128xf32>
    %16 = arith.maximumf %14, %15 : vector<8x128xf32>
    %c256 = arith.constant 256 : index
    %c0_13 = arith.constant 0 : index
    %17 = vector.load %arg2[%c256, %c0_13] : memref<1024x128xf32, #tpu.memory_space<vmem>>, vector<128x128xf32>
    %cst_14 = arith.constant dense<0.000000e+00> : vector<8x128xf32>
    %18 = tpu.matmul %16, %17, %cst_14 {dimension_numbers = #tpu.dot_dimension_numbers<[1], [0], [0], [1], [0, 0, 1, 1], [], []>} : vector<8x128xf32>, vector<128x128xf32>, vector<8x128xf32> -> vector<8x128xf32>
    %cst_15 = arith.constant 0.000000e+00 : f32
    %19 = vector.broadcast %cst_15 : f32 to vector<8x128xf32>
    %20 = arith.maximumf %18, %19 : vector<8x128xf32>
    %c384 = arith.constant 384 : index
    %c0_16 = arith.constant 0 : index
    %21 = vector.load %arg2[%c384, %c0_16] : memref<1024x128xf32, #tpu.memory_space<vmem>>, vector<128x128xf32>
    %cst_17 = arith.constant dense<0.000000e+00> : vector<8x128xf32>
    %22 = tpu.matmul %20, %21, %cst_17 {dimension_numbers = #tpu.dot_dimension_numbers<[1], [0], [0], [1], [0, 0, 1, 1], [], []>} : vector<8x128xf32>, vector<128x128xf32>, vector<8x128xf32> -> vector<8x128xf32>
    %c512 = arith.constant 512 : index
    %c0_18 = arith.constant 0 : index
    %23 = vector.load %arg2[%c512, %c0_18] : memref<1024x128xf32, #tpu.memory_space<vmem>>, vector<128x128xf32>
    %cst_19 = arith.constant dense<0.000000e+00> : vector<8x128xf32>
    %24 = tpu.matmul %22, %23, %cst_19 {dimension_numbers = #tpu.dot_dimension_numbers<[1], [0], [0], [1], [0, 0, 1, 1], [], []>} : vector<8x128xf32>, vector<128x128xf32>, vector<8x128xf32> -> vector<8x128xf32>
    %cst_20 = arith.constant 0.000000e+00 : f32
    %25 = vector.broadcast %cst_20 : f32 to vector<8x128xf32>
    %26 = arith.maximumf %24, %25 : vector<8x128xf32>
    %c640 = arith.constant 640 : index
    %c0_21 = arith.constant 0 : index
    %27 = vector.load %arg2[%c640, %c0_21] : memref<1024x128xf32, #tpu.memory_space<vmem>>, vector<128x128xf32>
    %cst_22 = arith.constant dense<0.000000e+00> : vector<8x128xf32>
    %28 = tpu.matmul %26, %27, %cst_22 {dimension_numbers = #tpu.dot_dimension_numbers<[1], [0], [0], [1], [0, 0, 1, 1], [], []>} : vector<8x128xf32>, vector<128x128xf32>, vector<8x128xf32> -> vector<8x128xf32>
    %cst_23 = arith.constant 0.000000e+00 : f32
    %29 = vector.broadcast %cst_23 : f32 to vector<8x128xf32>
    %30 = arith.maximumf %28, %29 : vector<8x128xf32>
    %c768 = arith.constant 768 : index
    %c0_24 = arith.constant 0 : index
    %31 = vector.load %arg2[%c768, %c0_24] : memref<1024x128xf32, #tpu.memory_space<vmem>>, vector<128x128xf32>
    %cst_25 = arith.constant dense<0.000000e+00> : vector<8x128xf32>
    %32 = tpu.matmul %30, %31, %cst_25 {dimension_numbers = #tpu.dot_dimension_numbers<[1], [0], [0], [1], [0, 0, 1, 1], [], []>} : vector<8x128xf32>, vector<128x128xf32>, vector<8x128xf32> -> vector<8x128xf32>
    %cst_26 = arith.constant 0.000000e+00 : f32
    %33 = vector.broadcast %cst_26 : f32 to vector<8x128xf32>
    %34 = arith.maximumf %32, %33 : vector<8x128xf32>
    %c896 = arith.constant 896 : index
    %c0_27 = arith.constant 0 : index
    %35 = vector.load %arg2[%c896, %c0_27] : memref<1024x128xf32, #tpu.memory_space<vmem>>, vector<128x128xf32>
    %cst_28 = arith.constant dense<0.000000e+00> : vector<8x128xf32>
    %36 = tpu.matmul %34, %35, %cst_28 {dimension_numbers = #tpu.dot_dimension_numbers<[1], [0], [0], [1], [0, 0, 1, 1], [], []>} : vector<8x128xf32>, vector<128x128xf32>, vector<8x128xf32> -> vector<8x128xf32>
    %37 = arith.addf %22, %36 : vector<8x128xf32>
    %c0_29 = arith.constant 0 : index
    %c0_30 = arith.constant 0 : index
    %38 = vector.load %arg3[%c0_29, %c0_30] : memref<8x128xf32, #tpu.memory_space<vmem>>, vector<8x128xf32>
    tpu.vector_store %arg3[%c0_29, %c0_30], %37 {strides = array<i32>} : memref<8x128xf32, #tpu.memory_space<vmem>>, vector<8x128xf32>,
    return
  }
  func.func @transform_0(%arg0: i32) -> (i32, i32) {
    %c0_i32 = arith.constant 0 : i32
    %c0_i32_0 = arith.constant 0 : i32
    return %arg0, %c0_i32 : i32, i32
  }
  func.func @transform_1(%arg0: i32) -> (i32, i32) {
    %c0_i32 = arith.constant 0 : i32
    %c0_i32_0 = arith.constant 0 : i32
    %c0_i32_1 = arith.constant 0 : i32
    return %c0_i32, %c0_i32_0 : i32, i32
  }
  func.func @transform_2(%arg0: i32) -> (i32, i32) {
    %c0_i32 = arith.constant 0 : i32
    %c0_i32_0 = arith.constant 0 : i32
    return %arg0, %c0_i32 : i32, i32
  }
}

module attributes {stable_mosaic.version = 11 : i64} {
  func.func @autoencoder_kernel(%arg0: i32, %arg1: memref<8x44xf32, #tpu.memory_space<vmem>>, %arg2: memref<1024x128xf32, #tpu.memory_space<vmem>>, %arg3: memref<8x128xf32, #tpu.memory_space<vmem>>, %arg4: memref<8x128xf32, #tpu.memory_space<vmem>>) attributes {dimension_semantics = [#tpu.dimension_semantics<parallel>], iteration_bounds = array<i64: 1>, scalar_prefetch = 0 : i64, scratch_operands = 1 : i64, tpu.core_type = #tpu.core_type<tc>, window_params = [{transform_indices = @transform_0, window_bounds = array<i64: 8, 44>}, {pipeline_mode = #tpu.pipeline_mode<synchronous>, transform_indices = @transform_1, window_bounds = array<i64: 1024, 128>}, {transform_indices = @transform_2, window_bounds = array<i64: 8, 128>}]} {
    %0 = tpu.iota {dimensions = array<i32: 1>} : vector<8x128xi32>
    %c127_i32 = arith.constant 127 : i32
    %1 = vector.broadcast %c127_i32 : i32 to vector<8x128xi32>
    %2 = arith.cmpi eq, %0, %1 : vector<8x128xi32>
    %3 = arith.extui %2 : vector<8x128xi1> to vector<8x128xi32>
    %4 = arith.sitofp %3 : vector<8x128xi32> to vector<8x128xf32>
    %c0 = arith.constant 0 : index
    %c0_0 = arith.constant 0 : index
    %5 = vector.load %arg4[%c0, %c0_0] : memref<8x128xf32, #tpu.memory_space<vmem>>, vector<8x128xf32>
    tpu.vector_store %arg4[%c0, %c0_0], %4 {strides = array<i32>} : memref<8x128xf32, #tpu.memory_space<vmem>>, vector<8x128xf32>,
    %c0_1 = arith.constant 0 : index
    %c0_2 = arith.constant 0 : index
    %6 = vector.load %arg1[%c0_1, %c0_2] : memref<8x44xf32, #tpu.memory_space<vmem>>, vector<8x44xf32>
    %c0_3 = arith.constant 0 : index
    %c0_4 = arith.constant 0 : index
    %7 = vector.load %arg4[%c0_3, %c0_4] : memref<8x128xf32, #tpu.memory_space<vmem>>, vector<8x44xf32>
    tpu.vector_store %arg4[%c0_3, %c0_4], %6 {strides = array<i32>} : memref<8x128xf32, #tpu.memory_space<vmem>>, vector<8x44xf32>,
    %c0_5 = arith.constant 0 : index
    %c0_6 = arith.constant 0 : index
    %8 = vector.load %arg4[%c0_5, %c0_6] : memref<8x128xf32, #tpu.memory_space<vmem>>, vector<8x128xf32>
    %c0_7 = arith.constant 0 : index
    %c0_8 = arith.constant 0 : index
    %9 = vector.load %arg2[%c0_7, %c0_8] : memref<1024x128xf32, #tpu.memory_space<vmem>>, vector<128x128xf32>
    %cst = arith.constant dense<0.000000e+00> : vector<8x128xf32>
    %10 = tpu.matmul %8, %9, %cst {dimension_numbers = #tpu.dot_dimension_numbers<[1], [0], [0], [1], [0, 0, 1, 1], [], []>} : vector<8x128xf32>, vector<128x128xf32>, vector<8x128xf32> -> vector<8x128xf32>
    %cst_9 = arith.constant 0.000000e+00 : f32
    %11 = vector.broadcast %cst_9 : f32 to vector<8x128xf32>
    %12 = arith.maximumf %10, %11 : vector<8x128xf32>
    %c128 = arith.constant 128 : index
    %c0_10 = arith.constant 0 : index
    %13 = vector.load %arg2[%c128, %c0_10] : memref<1024x128xf32, #tpu.memory_space<vmem>>, vector<128x128xf32>
    %cst_11 = arith.constant dense<0.000000e+00> : vector<8x128xf32>
    %14 = tpu.matmul %12, %13, %cst_11 {dimension_numbers = #tpu.dot_dimension_numbers<[1], [0], [0], [1], [0, 0, 1, 1], [], []>} : vector<8x128xf32>, vector<128x128xf32>, vector<8x128xf32> -> vector<8x128xf32>
    %cst_12 = arith.constant 0.000000e+00 : f32
    %15 = vector.broadcast %cst_12 : f32 to vector<8x128xf32>
    %16 = arith.maximumf %14, %15 : vector<8x128xf32>
    %c256 = arith.constant 256 : index
    %c0_13 = arith.constant 0 : index
    %17 = vector.load %arg2[%c256, %c0_13] : memref<1024x128xf32, #tpu.memory_space<vmem>>, vector<128x128xf32>
    %cst_14 = arith.constant dense<0.000000e+00> : vector<8x128xf32>
    %18 = tpu.matmul %16, %17, %cst_14 {dimension_numbers = #tpu.dot_dimension_numbers<[1], [0], [0], [1], [0, 0, 1, 1], [], []>} : vector<8x128xf32>, vector<128x128xf32>, vector<8x128xf32> -> vector<8x128xf32>
    %cst_15 = arith.constant 0.000000e+00 : f32
    %19 = vector.broadcast %cst_15 : f32 to vector<8x128xf32>
    %20 = arith.maximumf %18, %19 : vector<8x128xf32>
    %c384 = arith.constant 384 : index
    %c0_16 = arith.constant 0 : index
    %21 = vector.load %arg2[%c384, %c0_16] : memref<1024x128xf32, #tpu.memory_space<vmem>>, vector<128x128xf32>
    %cst_17 = arith.constant dense<0.000000e+00> : vector<8x128xf32>
    %22 = tpu.matmul %20, %21, %cst_17 {dimension_numbers = #tpu.dot_dimension_numbers<[1], [0], [0], [1], [0, 0, 1, 1], [], []>} : vector<8x128xf32>, vector<128x128xf32>, vector<8x128xf32> -> vector<8x128xf32>
    %c512 = arith.constant 512 : index
    %c0_18 = arith.constant 0 : index
    %23 = vector.load %arg2[%c512, %c0_18] : memref<1024x128xf32, #tpu.memory_space<vmem>>, vector<128x128xf32>
    %cst_19 = arith.constant dense<0.000000e+00> : vector<8x128xf32>
    %24 = tpu.matmul %22, %23, %cst_19 {dimension_numbers = #tpu.dot_dimension_numbers<[1], [0], [0], [1], [0, 0, 1, 1], [], []>} : vector<8x128xf32>, vector<128x128xf32>, vector<8x128xf32> -> vector<8x128xf32>
    %cst_20 = arith.constant 0.000000e+00 : f32
    %25 = vector.broadcast %cst_20 : f32 to vector<8x128xf32>
    %26 = arith.maximumf %24, %25 : vector<8x128xf32>
    %c640 = arith.constant 640 : index
    %c0_21 = arith.constant 0 : index
    %27 = vector.load %arg2[%c640, %c0_21] : memref<1024x128xf32, #tpu.memory_space<vmem>>, vector<128x128xf32>
    %cst_22 = arith.constant dense<0.000000e+00> : vector<8x128xf32>
    %28 = tpu.matmul %26, %27, %cst_22 {dimension_numbers = #tpu.dot_dimension_numbers<[1], [0], [0], [1], [0, 0, 1, 1], [], []>} : vector<8x128xf32>, vector<128x128xf32>, vector<8x128xf32> -> vector<8x128xf32>
    %cst_23 = arith.constant 0.000000e+00 : f32
    %29 = vector.broadcast %cst_23 : f32 to vector<8x128xf32>
    %30 = arith.maximumf %28, %29 : vector<8x128xf32>
    %c768 = arith.constant 768 : index
    %c0_24 = arith.constant 0 : index
    %31 = vector.load %arg2[%c768, %c0_24] : memref<1024x128xf32, #tpu.memory_space<vmem>>, vector<128x128xf32>
    %cst_25 = arith.constant dense<0.000000e+00> : vector<8x128xf32>
    %32 = tpu.matmul %30, %31, %cst_25 {dimension_numbers = #tpu.dot_dimension_numbers<[1], [0], [0], [1], [0, 0, 1, 1], [], []>} : vector<8x128xf32>, vector<128x128xf32>, vector<8x128xf32> -> vector<8x128xf32>
    %cst_26 = arith.constant 0.000000e+00 : f32
    %33 = vector.broadcast %cst_26 : f32 to vector<8x128xf32>
    %34 = arith.maximumf %32, %33 : vector<8x128xf32>
    %c896 = arith.constant 896 : index
    %c0_27 = arith.constant 0 : index
    %35 = vector.load %arg2[%c896, %c0_27] : memref<1024x128xf32, #tpu.memory_space<vmem>>, vector<128x128xf32>
    %cst_28 = arith.constant dense<0.000000e+00> : vector<8x128xf32>
    %36 = tpu.matmul %34, %35, %cst_28 {dimension_numbers = #tpu.dot_dimension_numbers<[1], [0], [0], [1], [0, 0, 1, 1], [], []>} : vector<8x128xf32>, vector<128x128xf32>, vector<8x128xf32> -> vector<8x128xf32>
    %37 = arith.addf %22, %36 : vector<8x128xf32>
    %c0_29 = arith.constant 0 : index
    %c0_30 = arith.constant 0 : index
    %38 = vector.load %arg3[%c0_29, %c0_30] : memref<8x128xf32, #tpu.memory_space<vmem>>, vector<8x128xf32>
    tpu.vector_store %arg3[%c0_29, %c0_30], %37 {strides = array<i32>} : memref<8x128xf32, #tpu.memory_space<vmem>>, vector<8x128xf32>,
    return
  }
  func.func @transform_0(%arg0: i32) -> (i32, i32) {
    %c0_i32 = arith.constant 0 : i32
    %c0_i32_0 = arith.constant 0 : i32
    return %arg0, %c0_i32 : i32, i32
  }
  func.func @transform_1(%arg0: i32) -> (i32, i32) {
    %c0_i32 = arith.constant 0 : i32
    %c0_i32_0 = arith.constant 0 : i32
    %c0_i32_1 = arith.constant 0 : i32
    return %c0_i32, %c0_i32_0 : i32, i32
  }
  func.func @transform_2(%arg0: i32) -> (i32, i32) {
    %c0_i32 = arith.constant 0 : i32
    %c0_i32_0 = arith.constant 0 : i32
    return %arg0, %c0_i32 : i32, i32
  }
}

</mosaic_0001>

<bundles_post_ra>
// kernel: tpu_custom_call.1
= control target key start
LH: loop header
LB: loop body
LE: loop exit
PB: predicated region body
PF: predicated region fallthrough
CT: control target
= control target key end

     0   :  { %7 = vsyncpa [#allocation4], 0  ;;  %s1600_s0 = inlined_call_operand.hbm [shape: f32[8,44], index: 0, kind: input, shape index: {}]   ;;  %s1601_s1 = inlined_call_operand.hbm [shape: f32[1024,128], index: 1, kind: input, shape index: {}]   ;;  %s1602_s2 = inlined_call_operand.hbm [shape: f32[8,128], index: 2, kind: output, shape index: {}]  }
   0x1   :  { %8 = vsyncpa [#allocation7], 0 }
   0x2   :  { %9 = vsyncpa [#allocation5], 0  ;;  %s1449_s9 = smov [#allocation3]   ;;  %s1450_s11 = smov [#allocation6]  }
   0x3   :  { %s16_s10 = sshll.u32 %s1449_s9, 4  ;;  %s25_s12 = sshll.u32 %s1450_s11, 4  ;;  %s17_s10 = int_to_ptr.vmem [resolvable:$true] %s16_s10  ;;  %s1472_s12 = int_to_ptr.vmem [resolvable:$true] %s25_s12 }
   0x4   :  { %s1377_s15 = scalar_lea.hbm %s1600_s0, 128 }
   0x5   :  { %p1378_p0 = scmp.ne.s32.totalorder %s1600_s0, %s1377_s15  ;;  %p1381_p1 = scmp.lt.u32.totalorder %s1377_s15, %s1600_s0 }
   0x7   :  { %p1383_p2 = pnand %p1381_p1, %p1378_p0 }
   0x9   :  { %1386 = shalt.err (!%p1383_p2)
}
   0xa   :  { %s1387_s20 = scalar_lea.vmem %s17_s10, 128  ;;  %p1392_p4 = scmp.lt.s32.totalorder %s17_s10, %s17_s10 }
   0xb   :  { %p1388_p3 = scmp.ne.s32.totalorder %s17_s10, %s1387_s20  ;;  %p1393_p5 = scmp.lt.s32.totalorder %s1387_s20, %s1387_s20 }
   0xd   :  { %p1394_p6 = por %p1393_p5, %p1392_p4 }
   0xf   :  { %p1395_p7 = pnand %p1394_p6, %p1388_p3 }
  0x11   :  { %1398 = shalt.err (!%p1395_p7)
}
  0x12   :  { %19 = dma.hbm_to_vmem [thread:$0]  %s1600_s0, 128, %s17_s10, [#allocation4]  }
  0x13   :  { %s1399_s25 = scalar_lea.hbm %s1601_s1, 16384 }
  0x14   :  { %p1400_p8 = scmp.ne.s32.totalorder %s1601_s1, %s1399_s25  ;;  %p1403_p9 = scmp.lt.u32.totalorder %s1399_s25, %s1601_s1 }
  0x16   :  { %p1405_p10 = pnand %p1403_p9, %p1400_p8 }
  0x18   :  { %1408 = shalt.err (!%p1405_p10)
}
  0x19   :  { %s1409_s30 = scalar_lea.vmem %s1472_s12, 16384  ;;  %p1414_p12 = scmp.lt.s32.totalorder %s1472_s12, %s1472_s12 }
  0x1a   :  { %p1410_p11 = scmp.ne.s32.totalorder %s1472_s12, %s1409_s30  ;;  %p1415_p13 = scmp.lt.s32.totalorder %s1409_s30, %s1409_s30 }
  0x1c   :  { %p1416_p0 = por %p1415_p13, %p1414_p12 }
  0x1e   :  { %p1417_p1 = pnand %p1416_p0, %p1410_p11 }
  0x20   :  { %1420 = shalt.err (!%p1417_p1)
}
  0x21   :  { %s1451_s0 = smov 128   ;;  %s1452_s3 = smov 8  }
  0x22   :  { %31 = dma.hbm_to_vmem [thread:$0]  %s1601_s1, 16384, %s1472_s12, [#allocation7], %s1451_s0, %s1451_s0, %s1452_s3  }
  0x23   :  { %1443 = dma.done.wait [#allocation4], 128  }
  0x24   :  { %1444 = vsyncadd [#allocation4], 4294967168 }
  0x25   :  { %1445 = dma.done.wait [#allocation7], 16384  }
  0x26   :  { %1446 = vsyncadd [#allocation7], 4294950912  ;;  %v38_v0 = vlaneseq  ;;  %v1453_v1 = vmov 0.0|0.0   ;;  %vm1454_vm0 = vmmov 0   ;;  %v1455_v2 = vmov 0.0   ;;  %v48_v5 = vld [vmem:[#allocation6] sm:$0xff] }
  0x27   :  { %1177 = vmatprep.subr.bf16.mxu0 %v1453_v1  ;;  %929 = vmatprep.mubr.msk.f32.mxu0 %vm1454_vm0, %v1455_v2  ;;  %v49_v6 = vld [vmem:[#allocation6 + $0x8] sm:$0xff]  ;;  %v50_v7 = vld [vmem:[#allocation6 + $0x10] sm:$0xff]  ;;  %v51_v9 = vld [vmem:[#allocation6 + $0x18] sm:$0xff]  ;;  %vm45_vm2 = vcmask 359424   ;;  %s1456_s1 = smov [#allocation8]  }
  0x28   :  { %v39_v3 = vand.u32 127, %v38_v0  ;;  %1201 = vmatprep.subr.bf16.mxu1 %v1453_v1  ;;  %964 = vmatprep.mubr.msk.f32.mxu1 %vm1454_vm0, %v1455_v2  ;;  %v1178_v8 = vpack.c.bf16 %v49_v6, %v48_v5  ;;  %v1181_v10 = vpack.c.bf16 %v51_v9, %v50_v7  ;;  %v52_v11 = vld [vmem:[#allocation6 + $0x20] sm:$0xff]  ;;  %v53_v12 = vld [vmem:[#allocation6 + $0x28] sm:$0xff]  ;;  %v44_v13 = vld [vmem:[#allocation3] sm:$0xff]  ;;  %s750_s6 = sshll.u32 %s1456_s1, 4  ;;  %s751_s6 = int_to_ptr.vmem [resolvable:$true] %s750_s6 }
  0x29   :  { %v135_v14 = vld [vmem:[#allocation6 + $0x80] sm:$0xff]  ;;  %v136_v15 = vld [vmem:[#allocation6 + $0x88] sm:$0xff]  ;;  %v137_v16 = vld [vmem:[#allocation6 + $0x90] sm:$0xff]  ;;  %v1184_v18 = vpack.c.bf16 %v53_v12, %v52_v11  ;;  %s1421_s7 = scalar_lea.vmem %s751_s6, 128  ;;  %p1426_p3 = scmp.lt.s32.totalorder %s751_s6, %s751_s6 }
  0x2a   :  { %vm40_vm1 = vcmp.eq.s32.totalorder %v39_v3, 127  ;;  %1179 = vmatpush3.bf16.msra.mxu0 %v1178_v8  ;;  %v138_v17 = vld [vmem:[#allocation6 + $0x98] sm:$0xff]  ;;  %v1202_v19 = vpack.c.bf16 %v136_v15, %v135_v14  ;;  %v54_v20 = vld [vmem:[#allocation6 + $0x30] sm:$0xff]  ;;  %v139_v23 = vld [vmem:[#allocation6 + $0xa0] sm:$0xff]  ;;  %p1422_p2 = scmp.ne.s32.totalorder %s751_s6, %s1421_s7  ;;  %p1427_p4 = scmp.lt.s32.totalorder %s1421_s7, %s1421_s7 }
  0x2b   :  { %v760_v4 = vsel %vm40_vm1, 1.0, %v1455_v2  ;;  %1180 = vmatprep.subr.bf16.mxu0 %v1453_v1  ;;  %v55_v21 = vld [vmem:[#allocation6 + $0x38] sm:$0xff]  ;;  %v1205_v22 = vpack.c.bf16 %v138_v17, %v137_v16  ;;  %v140_v24 = vld [vmem:[#allocation6 + $0xa8] sm:$0xff]  ;;  %v56_v26 = vld [vmem:[#allocation6 + $0x40] sm:$0xff] }
  0x2c   :  { %43 = vst [vmem:[#allocation2] sm:$0xff] %v760_v4  ;;  %1203 = vmatpush3.bf16.msra.mxu1 %v1202_v19  ;;  %v1187_v25 = vpack.c.bf16 %v55_v21, %v54_v20  ;;  %v57_v27 = vld [vmem:[#allocation6 + $0x48] sm:$0xff]  ;;  %v1208_v28 = vpack.c.bf16 %v140_v24, %v139_v23  ;;  %v141_v29 = vld [vmem:[#allocation6 + $0xb0] sm:$0xff]  ;;  %v142_v30 = vld [vmem:[#allocation6 + $0xb8] sm:$0xff]  ;;  %p1428_p5 = por %p1427_p4, %p1426_p3 }
  0x2d   :  { %46 = vst.msk [vmem:[#allocation2] sm:$0xff] %vm45_vm2, %v44_v13  ;;  %1204 = vmatprep.subr.bf16.mxu1 %v1453_v1  ;;  %v1190_v31 = vpack.c.bf16 %v57_v27, %v56_v26  ;;  %v58_v32 = vld [vmem:[#allocation6 + $0x50] sm:$0xff]  ;;  %v59_v33 = vld [vmem:[#allocation6 + $0x58] sm:$0xff]  ;;  %v1211_v34 = vpack.c.bf16 %v142_v30, %v141_v29  ;;  %v143_v35 = vld [vmem:[#allocation6 + $0xc0] sm:$0xff] }
  0x2e   :  { %1182 = vmatpush3.bf16.msra.mxu0 %v1181_v10  ;;  %v144_v36 = vld [vmem:[#allocation6 + $0xc8] sm:$0xff]  ;;  %v1193_v37 = vpack.c.bf16 %v59_v33, %v58_v32  ;;  %v60_v38 = vld [vmem:[#allocation6 + $0x60] sm:$0xff]  ;;  %v145_v41 = vld [vmem:[#allocation6 + $0xd0] sm:$0xff]  ;;  %p1429_p6 = pnand %p1428_p5, %p1422_p2 }
  0x2f   :  { %1183 = vmatprep.subr.bf16.mxu0 %v1453_v1  ;;  %v61_v39 = vld [vmem:[#allocation6 + $0x68] sm:$0xff]  ;;  %v1214_v40 = vpack.c.bf16 %v144_v36, %v143_v35  ;;  %v146_v42 = vld [vmem:[#allocation6 + $0xd8] sm:$0xff]  ;;  %v62_v44 = vld [vmem:[#allocation6 + $0x70] sm:$0xff] }
  0x30   :  { %1206 = vmatpush3.bf16.msra.mxu1 %v1205_v22  ;;  %v1196_v43 = vpack.c.bf16 %v61_v39, %v60_v38  ;;  %v63_v45 = vld [vmem:[#allocation6 + $0x78] sm:$0xff]  ;;  %v1217_v46 = vpack.c.bf16 %v146_v42, %v145_v41  ;;  %v147_v47 = vld [vmem:[#allocation6 + $0xe0] sm:$0xff]  ;;  %v148_v48 = vld [vmem:[#allocation6 + $0xe8] sm:$0xff] }
  0x31   :  { %1207 = vmatprep.subr.bf16.mxu1 %v1453_v1  ;;  %v1199_v49 = vpack.c.bf16 %v63_v45, %v62_v44  ;;  %v1220_v50 = vpack.c.bf16 %v148_v48, %v147_v47  ;;  %v149_v52 = vld [vmem:[#allocation6 + $0xf0] sm:$0xff]  ;;  %v150_v53 = vld [vmem:[#allocation6 + $0xf8] sm:$0xff]  ;;  %v222_v55 = vld [vmem:[#allocation6 + $0x100] sm:$0xff] }
  0x32   :  { %1185 = vmatpush3.bf16.msra.mxu0 %v1184_v18  ;;  %v1223_v54 = vpack.c.bf16 %v150_v53, %v149_v52  ;;  %v223_v56 = vld [vmem:[#allocation6 + $0x108] sm:$0xff]  ;;  %v224_v57 = vld [vmem:[#allocation6 + $0x110] sm:$0xff]  ;;  %v225_v59 = vld [vmem:[#allocation6 + $0x118] sm:$0xff] }
  0x33   :  { %1186 = vmatprep.subr.bf16.mxu0 %v1453_v1  ;;  %v1226_v58 = vpack.c.bf16 %v223_v56, %v222_v55  ;;  %v1229_v60 = vpack.c.bf16 %v225_v59, %v224_v57  ;;  %v226_v61 = vld [vmem:[#allocation6 + $0x120] sm:$0xff]  ;;  %v227_v62 = vld [vmem:[#allocation6 + $0x128] sm:$0xff]  ;;  %v228_v0 = vld [vmem:[#allocation6 + $0x130] sm:$0xff] }
  0x34   :  { %1209 = vmatpush3.bf16.msra.mxu1 %v1208_v28  ;;  %v47_v51 = vld [vmem:[#allocation2] sm:$0xff]  ;;  %v1232_v63 = vpack.c.bf16 %v227_v62, %v226_v61  ;;  %v229_v3 = vld [vmem:[#allocation6 + $0x138] sm:$0xff]  ;;  %v230_v5 = vld [vmem:[#allocation6 + $0x140] sm:$0xff] }
  0x35   :  { %1210 = vmatprep.subr.bf16.mxu1 %v1453_v1  ;;  %v1235_v4 = vpack.c.bf16 %v229_v3, %v228_v0  ;;  %v231_v6 = vld [vmem:[#allocation6 + $0x148] sm:$0xff]  ;;  %v232_v8 = vld [vmem:[#allocation6 + $0x150] sm:$0xff]  ;;  %v233_v9 = vld [vmem:[#allocation6 + $0x158] sm:$0xff] }
  0x36   :  { %1188 = vmatpush3.bf16.msra.mxu0 %v1187_v25  ;;  %v1238_v7 = vpack.c.bf16 %v231_v6, %v230_v5  ;;  %v1241_v10 = vpack.c.bf16 %v233_v9, %v232_v8  ;;  %v234_v11 = vld [vmem:[#allocation6 + $0x160] sm:$0xff]  ;;  %v235_v12 = vld [vmem:[#allocation6 + $0x168] sm:$0xff]  ;;  %v236_v17 = vld [vmem:[#allocation6 + $0x170] sm:$0xff] }
  0x37   :  { %1189 = vmatprep.subr.bf16.mxu0 %v1453_v1  ;;  %v1244_v13 = vpack.c.bf16 %v235_v12, %v234_v11  ;;  %v237_v18 = vld [vmem:[#allocation6 + $0x178] sm:$0xff]  ;;  %v309_v20 = vld [vmem:[#allocation6 + $0x180] sm:$0xff]  ;;  %v310_v21 = vld [vmem:[#allocation6 + $0x188] sm:$0xff] }
  0x38   :  { %1212 = vmatpush3.bf16.msra.mxu1 %v1211_v34  ;;  %v1247_v19 = vpack.c.bf16 %v237_v18, %v236_v17  ;;  %v311_v22 = vld [vmem:[#allocation6 + $0x190] sm:$0xff]  ;;  %v1250_v23 = vpack.c.bf16 %v310_v21, %v309_v20  ;;  %v312_v24 = vld [vmem:[#allocation6 + $0x198] sm:$0xff]  ;;  %v313_v26 = vld [vmem:[#allocation6 + $0x1a0] sm:$0xff] }
  0x39   :  { %1213 = vmatprep.subr.bf16.mxu1 %v1453_v1  ;;  %v1253_v25 = vpack.c.bf16 %v312_v24, %v311_v22  ;;  %v314_v27 = vld [vmem:[#allocation6 + $0x1a8] sm:$0xff]  ;;  %v315_v29 = vld [vmem:[#allocation6 + $0x1b0] sm:$0xff]  ;;  %v316_v30 = vld [vmem:[#allocation6 + $0x1b8] sm:$0xff] }
  0x3a   :  { %1191 = vmatpush3.bf16.msra.mxu0 %v1190_v31  ;;  %v1256_v28 = vpack.c.bf16 %v314_v27, %v313_v26  ;;  %v1259_v31 = vpack.c.bf16 %v316_v30, %v315_v29  ;;  %v317_v32 = vld [vmem:[#allocation6 + $0x1c0] sm:$0xff]  ;;  %v318_v33 = vld [vmem:[#allocation6 + $0x1c8] sm:$0xff]  ;;  %v319_v35 = vld [vmem:[#allocation6 + $0x1d0] sm:$0xff] }
  0x3b   :  { %1192 = vmatprep.subr.bf16.mxu0 %v1453_v1  ;;  %v1262_v34 = vpack.c.bf16 %v318_v33, %v317_v32  ;;  %v320_v36 = vld [vmem:[#allocation6 + $0x1d8] sm:$0xff]  ;;  %v321_v38 = vld [vmem:[#allocation6 + $0x1e0] sm:$0xff]  ;;  %v322_v39 = vld [vmem:[#allocation6 + $0x1e8] sm:$0xff] }
  0x3c   :  { %1215 = vmatpush3.bf16.msra.mxu1 %v1214_v40  ;;  %v1268_v40 = vpack.c.bf16 %v322_v39, %v321_v38  ;;  %v323_v44 = vld [vmem:[#allocation6 + $0x1f0] sm:$0xff]  ;;  %v324_v45 = vld [vmem:[#allocation6 + $0x1f8] sm:$0xff]  ;;  %v395_v47 = vld [vmem:[#allocation6 + $0x200] sm:$0xff] }
  0x3d   :  { %1216 = vmatprep.subr.bf16.mxu1 %v1453_v1  ;;  %v396_v48 = vld [vmem:[#allocation6 + $0x208] sm:$0xff]  ;;  %v399_v53 = vld [vmem:[#allocation6 + $0x220] sm:$0xff]  ;;  %v401_v56 = vld [vmem:[#allocation6 + $0x230] sm:$0xff] }
  0x3e   :  { %1194 = vmatpush3.bf16.msra.mxu0 %v1193_v37  ;;  %v1265_v37 = vpack.c.bf16 %v320_v36, %v319_v35  ;;  %v402_v57 = vld [vmem:[#allocation6 + $0x238] sm:$0xff]  ;;  %v403_v59 = vld [vmem:[#allocation6 + $0x240] sm:$0xff]  ;;  %v405_v62 = vld [vmem:[#allocation6 + $0x250] sm:$0xff] }
  0x3f   :  { %1195 = vmatprep.subr.bf16.mxu0 %v1453_v1  ;;  %v407_v3 = vld [vmem:[#allocation6 + $0x260] sm:$0xff]  ;;  %v409_v6 = vld [vmem:[#allocation6 + $0x270] sm:$0xff]  ;;  %v489_v22 = vld [vmem:[#allocation6 + $0x2b8] sm:$0xff] }
  0x40   :  { %1218 = vmatpush3.bf16.msra.mxu1 %v1217_v46  ;;  %v1271_v46 = vpack.c.bf16 %v324_v45, %v323_v44  ;;  %v482_v12 = vld [vmem:[#allocation6 + $0x280] sm:$0xff]  ;;  %v488_v21 = vld [vmem:[#allocation6 + $0x2b0] sm:$0xff]  ;;  %v497_v36 = vld [vmem:[#allocation6 + $0x2f8] sm:$0xff] }
  0x41   :  { %1219 = vmatprep.subr.bf16.mxu1 %v1453_v1  ;;  %v486_v18 = vld [vmem:[#allocation6 + $0x2a0] sm:$0xff]  ;;  %v492_v27 = vld [vmem:[#allocation6 + $0x2d0] sm:$0xff]  ;;  %v570_v39 = vld [vmem:[#allocation6 + $0x308] sm:$0xff] }
  0x42   :  { %1197 = vmatpush3.bf16.msra.mxu0 %v1196_v43  ;;  %v490_v24 = vld [vmem:[#allocation6 + $0x2c0] sm:$0xff]  ;;  %v496_v35 = vld [vmem:[#allocation6 + $0x2f0] sm:$0xff]  ;;  %v574_v45 = vld [vmem:[#allocation6 + $0x328] sm:$0xff] }
  0x43   :  { %1198 = vmatprep.subr.bf16.mxu0 %v1453_v1  ;;  %v494_v30 = vld [vmem:[#allocation6 + $0x2e0] sm:$0xff] }
  0x44   :  { %1221 = vmatpush3.bf16.msra.mxu1 %v1220_v50  ;;  %v1274_v50 = vpack.c.bf16 %v396_v48, %v395_v47  ;;  %v569_v38 = vld [vmem:[#allocation6 + $0x300] sm:$0xff]  ;;  %v575_v47 = vld [vmem:[#allocation6 + $0x330] sm:$0xff]  ;;  %v576_v48 = vld [vmem:[#allocation6 + $0x338] sm:$0xff] }
  0x45   :  { %1222 = vmatprep.subr.bf16.mxu1 %v1453_v1  ;;  %v573_v44 = vld [vmem:[#allocation6 + $0x320] sm:$0xff] }
  0x46   :  { %1200 = vmatpush3.bf16.msra.mxu0 %v1199_v49  ;;  %v397_v49 = vld [vmem:[#allocation6 + $0x210] sm:$0xff] }
  0x47   :  { %1225 = vmatprep.subr.bf16.mxu0 %v1453_v1 }
  0x48   :  { %1224 = vmatpush3.bf16.msra.mxu1 %v1223_v54  ;;  %v400_v54 = vld [vmem:[#allocation6 + $0x228] sm:$0xff] }
  0x49   :  { %930 = vmatmul.mubr.f32.vlgmr.msra.gmra.mrb[0].mxu0 %v47_v51  ;;  %1249 = vmatprep.subr.bf16.mxu1 %v1453_v1  ;;  %v398_v51 = vld [vmem:[#allocation6 + $0x218] sm:$0xff]  ;;  %v1280_v55 = vpack.c.bf16 %v400_v54, %v399_v53  ;;  %v579_v53 = vld [vmem:[#allocation6 + $0x350] sm:$0xff] }
  0x4a   :  { %999 = vmatprep.mubr.msk.f32.mxu0 %vm1454_vm0, %v1455_v2  ;;  %1227 = vmatpush3.bf16.msra.mxu0 %v1226_v58  ;;  %v1277_v52 = vpack.c.bf16 %v398_v51, %v397_v49  ;;  %v1283_v58 = vpack.c.bf16 %v402_v57, %v401_v56  ;;  %v1331_v49 = vpack.c.bf16 %v576_v48, %v575_v47  ;;  %v578_v51 = vld [vmem:[#allocation6 + $0x348] sm:$0xff]  ;;  %v580_v54 = vld [vmem:[#allocation6 + $0x358] sm:$0xff]  ;;  %v581_v56 = vld [vmem:[#allocation6 + $0x360] sm:$0xff] }
  0x4b   :  { %1228 = vmatprep.subr.bf16.mxu0 %v1453_v1  ;;  %v582_v57 = vld [vmem:[#allocation6 + $0x368] sm:$0xff] }
  0x4e   :  { %1230 = vmatpush3.bf16.msra.mxu0 %v1229_v60  ;;  %v404_v60 = vld [vmem:[#allocation6 + $0x248] sm:$0xff] }
  0x4f   :  { %1231 = vmatprep.subr.bf16.mxu0 %v1453_v1  ;;  %v1286_v61 = vpack.c.bf16 %v404_v60, %v403_v59 }
  0x52   :  { %1233 = vmatpush3.bf16.msra.mxu0 %v1232_v63  ;;  %v406_v63 = vld [vmem:[#allocation6 + $0x258] sm:$0xff] }
  0x53   :  { %1234 = vmatprep.subr.bf16.mxu0 %v1453_v1  ;;  %v1289_v0 = vpack.c.bf16 %v406_v63, %v405_v62  ;;  %v583_v62 = vld [vmem:[#allocation6 + $0x370] sm:$0xff]  ;;  %v584_v63 = vld [vmem:[#allocation6 + $0x378] sm:$0xff] }
  0x56   :  { %1236 = vmatpush3.bf16.msra.mxu0 %v1235_v4  ;;  %v408_v4 = vld [vmem:[#allocation6 + $0x268] sm:$0xff] }
  0x57   :  { %1237 = vmatprep.subr.bf16.mxu0 %v1453_v1  ;;  %v1292_v5 = vpack.c.bf16 %v408_v4, %v407_v3  ;;  %v656_v3 = vld [vmem:[#allocation6 + $0x380] sm:$0xff]  ;;  %v657_v4 = vld [vmem:[#allocation6 + $0x388] sm:$0xff] }
  0x5a   :  { %1239 = vmatpush3.bf16.msra.mxu0 %v1238_v7  ;;  %v410_v7 = vld [vmem:[#allocation6 + $0x278] sm:$0xff] }
  0x5b   :  { %1240 = vmatprep.subr.bf16.mxu0 %v1453_v1  ;;  %v1295_v8 = vpack.c.bf16 %v410_v7, %v409_v6  ;;  %v1346_v6 = vpack.c.bf16 %v657_v4, %v656_v3  ;;  %v659_v7 = vld [vmem:[#allocation6 + $0x398] sm:$0xff] }
  0x5e   :  { %1242 = vmatpush3.bf16.msra.mxu0 %v1241_v10 }
  0x5f   :  { %1243 = vmatprep.subr.bf16.mxu0 %v1453_v1 }
  0x62   :  { %1245 = vmatpush3.bf16.msra.mxu0 %v1244_v13  ;;  %v483_v13 = vld [vmem:[#allocation6 + $0x288] sm:$0xff] }
  0x63   :  { %1246 = vmatprep.subr.bf16.mxu0 %v1453_v1 }
  0x66   :  { %1248 = vmatpush3.bf16.msra.mxu0 %v1247_v19  ;;  %v487_v19 = vld [vmem:[#allocation6 + $0x2a8] sm:$0xff] }
  0x67   :  { %1273 = vmatprep.subr.bf16.mxu0 %v1453_v1  ;;  %v1304_v20 = vpack.c.bf16 %v487_v19, %v486_v18  ;;  %v667_v18 = vld [vmem:[#allocation6 + $0x3d8] sm:$0xff] }
 0x11c   :  { %v130_v14 = vpop.f32.mrb[0].mxu0 }
 0x11d   :  { %v134_v15 = vmax.f32 %v130_v14, 0.0  ;;  %v931_v16 = vpop.f32.mrb[1].mxu0  ;;  %v484_v14 = vld [vmem:[#allocation6 + $0x290] sm:$0xff] }
 0x11e   :  { %v485_v16 = vld [vmem:[#allocation6 + $0x298] sm:$0xff] }
 0x11f   :  { %965 = vmatmul.mubr.f32.vlgmr.msra.gmra.mrb[0].mxu1 %v134_v15  ;;  %v1298_v15 = vpack.c.bf16 %v483_v13, %v482_v12  ;;  %v1301_v17 = vpack.c.bf16 %v485_v16, %v484_v14  ;;  %v663_v12 = vld [vmem:[#allocation6 + $0x3b8] sm:$0xff]  ;;  %v664_v14 = vld [vmem:[#allocation6 + $0x3c0] sm:$0xff] }
 0x120   :  { %1034 = vmatprep.mubr.msk.f32.mxu1 %vm1454_vm0, %v1455_v2  ;;  %1251 = vmatpush3.bf16.msra.mxu1 %v1250_v23  ;;  %v1307_v23 = vpack.c.bf16 %v489_v22, %v488_v21  ;;  %v669_v21 = vld [vmem:[#allocation6 + $0x3e8] sm:$0xff] }
 0x121   :  { %1252 = vmatprep.subr.bf16.mxu1 %v1453_v1 }
 0x124   :  { %1254 = vmatpush3.bf16.msra.mxu1 %v1253_v25  ;;  %v491_v25 = vld [vmem:[#allocation6 + $0x2c8] sm:$0xff] }
 0x125   :  { %1255 = vmatprep.subr.bf16.mxu1 %v1453_v1  ;;  %v1310_v26 = vpack.c.bf16 %v491_v25, %v490_v24 }
 0x128   :  { %1257 = vmatpush3.bf16.msra.mxu1 %v1256_v28  ;;  %v493_v28 = vld [vmem:[#allocation6 + $0x2d8] sm:$0xff] }
 0x129   :  { %1258 = vmatprep.subr.bf16.mxu1 %v1453_v1  ;;  %v1313_v29 = vpack.c.bf16 %v493_v28, %v492_v27  ;;  %v671_v27 = vld [vmem:[#allocation6 + $0x3f8] sm:$0xff] }
 0x12c   :  { %1260 = vmatpush3.bf16.msra.mxu1 %v1259_v31  ;;  %v495_v31 = vld [vmem:[#allocation6 + $0x2e8] sm:$0xff] }
 0x12d   :  { %1261 = vmatprep.subr.bf16.mxu1 %v1453_v1  ;;  %v1316_v32 = vpack.c.bf16 %v495_v31, %v494_v30 }
 0x130   :  { %1263 = vmatpush3.bf16.msra.mxu1 %v1262_v34 }
 0x131   :  { %1264 = vmatprep.subr.bf16.mxu1 %v1453_v1 }
 0x134   :  { %1266 = vmatpush3.bf16.msra.mxu1 %v1265_v37  ;;  %v1319_v37 = vpack.c.bf16 %v497_v36, %v496_v35 }
 0x135   :  { %1267 = vmatprep.subr.bf16.mxu1 %v1453_v1 }
 0x138   :  { %1269 = vmatpush3.bf16.msra.mxu1 %v1268_v40  ;;  %v571_v40 = vld [vmem:[#allocation6 + $0x310] sm:$0xff] }
 0x139   :  { %1270 = vmatprep.subr.bf16.mxu1 %v1453_v1 }
 0x13c   :  { %1272 = vmatpush3.bf16.msra.mxu1 %v1271_v46  ;;  %v1328_v46 = vpack.c.bf16 %v574_v45, %v573_v44 }
 0x13d   :  { %1297 = vmatprep.subr.bf16.mxu1 %v1453_v1 }
 0x1f2   :  { %v217_v41 = vpop.f32.mrb[0].mxu1 }
 0x1f3   :  { %v221_v42 = vmax.f32 %v217_v41, 0.0  ;;  %v966_v43 = vpop.f32.mrb[1].mxu1  ;;  %v1322_v41 = vpack.c.bf16 %v570_v39, %v569_v38 }
 0x1f5   :  { %1000 = vmatmul.mubr.f32.vlgmr.msra.gmra.mrb[2].mxu0 %v221_v42  ;;  %v572_v42 = vld [vmem:[#allocation6 + $0x318] sm:$0xff] }
 0x1f6   :  { %1069 = vmatprep.mubr.msk.f32.mxu0 %vm1454_vm0, %v1455_v2  ;;  %1275 = vmatpush3.bf16.msra.mxu0 %v1274_v50  ;;  %v1325_v43 = vpack.c.bf16 %v572_v42, %v571_v40  ;;  %v577_v50 = vld [vmem:[#allocation6 + $0x340] sm:$0xff] }
 0x1f7   :  { %1276 = vmatprep.subr.bf16.mxu0 %v1453_v1 }
 0x1fa   :  { %1278 = vmatpush3.bf16.msra.mxu0 %v1277_v52  ;;  %v1334_v52 = vpack.c.bf16 %v578_v51, %v577_v50 }
 0x1fb   :  { %1279 = vmatprep.subr.bf16.mxu0 %v1453_v1 }
 0x1fe   :  { %1281 = vmatpush3.bf16.msra.mxu0 %v1280_v55  ;;  %v1337_v55 = vpack.c.bf16 %v580_v54, %v579_v53 }
 0x1ff   :  { %1282 = vmatprep.subr.bf16.mxu0 %v1453_v1 }
 0x202   :  { %1284 = vmatpush3.bf16.msra.mxu0 %v1283_v58  ;;  %v1340_v58 = vpack.c.bf16 %v582_v57, %v581_v56 }
 0x203   :  { %1285 = vmatprep.subr.bf16.mxu0 %v1453_v1 }
 0x206   :  { %1287 = vmatpush3.bf16.msra.mxu0 %v1286_v61 }
 0x207   :  { %1288 = vmatprep.subr.bf16.mxu0 %v1453_v1 }
 0x20a   :  { %1290 = vmatpush3.bf16.msra.mxu0 %v1289_v0  ;;  %v1343_v0 = vpack.c.bf16 %v584_v63, %v583_v62 }
 0x20b   :  { %1291 = vmatprep.subr.bf16.mxu0 %v1453_v1 }
 0x20e   :  { %1293 = vmatpush3.bf16.msra.mxu0 %v1292_v5  ;;  %v658_v5 = vld [vmem:[#allocation6 + $0x390] sm:$0xff] }
 0x20f   :  { %1294 = vmatprep.subr.bf16.mxu0 %v1453_v1 }
 0x212   :  { %1296 = vmatpush3.bf16.msra.mxu0 %v1295_v8  ;;  %v1349_v8 = vpack.c.bf16 %v659_v7, %v658_v5 }
 0x213   :  { %1321 = vmatprep.subr.bf16.mxu0 %v1453_v1 }
 0x2c8   :  { %v304_v9 = vpop.f32.mrb[2].mxu0 }
 0x2c9   :  { %v308_v10 = vmax.f32 %v304_v9, 0.0  ;;  %v1001_v11 = vpop.f32.mrb[3].mxu0  ;;  %v660_v9 = vld [vmem:[#allocation6 + $0x3a0] sm:$0xff] }
 0x2cb   :  { %1035 = vmatmul.mubr.f32.vlgmr.msra.gmra.mrb[2].mxu1 %v308_v10  ;;  %v661_v10 = vld [vmem:[#allocation6 + $0x3a8] sm:$0xff] }
 0x2cc   :  { %1104 = vmatprep.mubr.msk.f32.mxu1 %vm1454_vm0, %v1455_v2  ;;  %1299 = vmatpush3.bf16.msra.mxu1 %v1298_v15  ;;  %v1352_v11 = vpack.c.bf16 %v661_v10, %v660_v9  ;;  %v665_v15 = vld [vmem:[#allocation6 + $0x3c8] sm:$0xff] }
 0x2cd   :  { %1300 = vmatprep.subr.bf16.mxu1 %v1453_v1  ;;  %v1358_v16 = vpack.c.bf16 %v665_v15, %v664_v14 }
 0x2d0   :  { %1302 = vmatpush3.bf16.msra.mxu1 %v1301_v17  ;;  %v666_v17 = vld [vmem:[#allocation6 + $0x3d0] sm:$0xff] }
 0x2d1   :  { %1303 = vmatprep.subr.bf16.mxu1 %v1453_v1  ;;  %v1361_v19 = vpack.c.bf16 %v667_v18, %v666_v17 }
 0x2d4   :  { %1305 = vmatpush3.bf16.msra.mxu1 %v1304_v20  ;;  %v668_v20 = vld [vmem:[#allocation6 + $0x3e0] sm:$0xff] }
 0x2d5   :  { %1306 = vmatprep.subr.bf16.mxu1 %v1453_v1  ;;  %v1364_v22 = vpack.c.bf16 %v669_v21, %v668_v20 }
 0x2d8   :  { %1308 = vmatpush3.bf16.msra.mxu1 %v1307_v23 }
 0x2d9   :  { %1309 = vmatprep.subr.bf16.mxu1 %v1453_v1 }
 0x2dc   :  { %1311 = vmatpush3.bf16.msra.mxu1 %v1310_v26  ;;  %v670_v26 = vld [vmem:[#allocation6 + $0x3f0] sm:$0xff] }
 0x2dd   :  { %1312 = vmatprep.subr.bf16.mxu1 %v1453_v1  ;;  %v1367_v28 = vpack.c.bf16 %v671_v27, %v670_v26 }
 0x2e0   :  { %1314 = vmatpush3.bf16.msra.mxu1 %v1313_v29 }
 0x2e1   :  { %1315 = vmatprep.subr.bf16.mxu1 %v1453_v1 }
 0x2e4   :  { %1317 = vmatpush3.bf16.msra.mxu1 %v1316_v32 }
 0x2e5   :  { %1318 = vmatprep.subr.bf16.mxu1 %v1453_v1 }
 0x2e8   :  { %1320 = vmatpush3.bf16.msra.mxu1 %v1319_v37 }
 0x2e9   :  { %1345 = vmatprep.subr.bf16.mxu1 %v1453_v1 }
 0x39e   :  { %v1565_v33 = vpop.f32.mrb[2].mxu1 }
 0x39f   :  { %v1036_v34 = vpop.f32.mrb[3].mxu1  ;;  %1070 = vmatmul.mubr.f32.vlgmr.msra.gmra.mrb[4].mxu0 %v1565_v33 }
 0x3a0   :  { %1139 = vmatprep.mubr.msk.f32.mxu0 %vm1454_vm0, %v1455_v2  ;;  %1323 = vmatpush3.bf16.msra.mxu0 %v1322_v41 }
 0x3a1   :  { %1324 = vmatprep.subr.bf16.mxu0 %v1453_v1 }
 0x3a4   :  { %1326 = vmatpush3.bf16.msra.mxu0 %v1325_v43 }
 0x3a5   :  { %1327 = vmatprep.subr.bf16.mxu0 %v1453_v1 }
 0x3a8   :  { %1329 = vmatpush3.bf16.msra.mxu0 %v1328_v46 }
 0x3a9   :  { %1330 = vmatprep.subr.bf16.mxu0 %v1453_v1 }
 0x3ac   :  { %1332 = vmatpush3.bf16.msra.mxu0 %v1331_v49 }
 0x3ad   :  { %1333 = vmatprep.subr.bf16.mxu0 %v1453_v1 }
 0x3b0   :  { %1335 = vmatpush3.bf16.msra.mxu0 %v1334_v52 }
 0x3b1   :  { %1336 = vmatprep.subr.bf16.mxu0 %v1453_v1 }
 0x3b4   :  { %1338 = vmatpush3.bf16.msra.mxu0 %v1337_v55 }
 0x3b5   :  { %1339 = vmatprep.subr.bf16.mxu0 %v1453_v1 }
 0x3b8   :  { %1341 = vmatpush3.bf16.msra.mxu0 %v1340_v58 }
 0x3b9   :  { %1342 = vmatprep.subr.bf16.mxu0 %v1453_v1 }
 0x3bc   :  { %1344 = vmatpush3.bf16.msra.mxu0 %v1343_v0 }
 0x472   :  { %v477_v59 = vpop.f32.mrb[4].mxu0 }
 0x473   :  { %v481_v60 = vmax.f32 %v477_v59, 0.0  ;;  %v1071_v61 = vpop.f32.mrb[5].mxu0 }
 0x475   :  { %1105 = vmatmul.mubr.f32.vlgmr.msra.gmra.mrb[4].mxu1 %v481_v60 }
 0x476   :  { %1174 = vmatprep.mubr.msk.f32.mxu1 %vm1454_vm0, %v1455_v2  ;;  %1347 = vmatpush3.bf16.msra.mxu1 %v1346_v6  ;;  %v662_v2 = vld [vmem:[#allocation6 + $0x3b0] sm:$0xff] }
 0x477   :  { %1348 = vmatprep.subr.bf16.mxu1 %v1453_v1  ;;  %v1355_v13 = vpack.c.bf16 %v663_v12, %v662_v2 }
 0x47a   :  { %1350 = vmatpush3.bf16.msra.mxu1 %v1349_v8 }
 0x47b   :  { %1351 = vmatprep.subr.bf16.mxu1 %v1453_v1 }
 0x47e   :  { %1353 = vmatpush3.bf16.msra.mxu1 %v1352_v11 }
 0x47f   :  { %1354 = vmatprep.subr.bf16.mxu1 %v1453_v1 }
 0x482   :  { %1356 = vmatpush3.bf16.msra.mxu1 %v1355_v13 }
 0x483   :  { %1357 = vmatprep.subr.bf16.mxu1 %v1453_v1 }
 0x486   :  { %1359 = vmatpush3.bf16.msra.mxu1 %v1358_v16 }
 0x487   :  { %1360 = vmatprep.subr.bf16.mxu1 %v1453_v1 }
 0x48a   :  { %1362 = vmatpush3.bf16.msra.mxu1 %v1361_v19 }
 0x48b   :  { %1363 = vmatprep.subr.bf16.mxu1 %v1453_v1 }
 0x48e   :  { %1365 = vmatpush3.bf16.msra.mxu1 %v1364_v22 }
 0x48f   :  { %1366 = vmatprep.subr.bf16.mxu1 %v1453_v1 }
 0x492   :  { %1368 = vmatpush3.bf16.msra.mxu1 %v1367_v28 }
 0x548   :  { %v564_v23 = vpop.f32.mrb[4].mxu1 }
 0x549   :  { %v568_v24 = vmax.f32 %v564_v23, 0.0  ;;  %v1106_v25 = vpop.f32.mrb[5].mxu1 }
 0x54b   :  { %1140 = vmatmul.mubr.f32.vlgmr.msra.gmra.mrb[6].mxu0 %v568_v24 }
 0x61e   :  { %v651_v29 = vpop.f32.mrb[6].mxu0 }
 0x61f   :  { %v655_v30 = vmax.f32 %v651_v29, 0.0  ;;  %v1141_v31 = vpop.f32.mrb[7].mxu0 }
 0x621   :  { %1175 = vmatmul.mubr.f32.vlgmr.msra.gmra.mrb[6].mxu1 %v655_v30 }
 0x6f4   :  { %v738_v32 = vpop.f32.mrb[6].mxu1 }
 0x6f5   :  { %v742_v34 = vadd.f32 %v738_v32, %v1565_v33  ;;  %v1176_v35 = vpop.f32.mrb[7].mxu1 }
 0x6f7   :  { %743 = vst [vmem:[#allocation8] sm:$0xff] %v742_v34 }
 0x6f8   :  { %1432 = shalt.err (!%p1429_p6)
}
 0x6f9   :  { %s1433_s10 = scalar_lea.hbm %s1602_s2, 128 }
 0x6fa   :  { %p1434_p7 = scmp.ne.s32.totalorder %s1602_s2, %s1433_s10  ;;  %p1437_p8 = scmp.lt.u32.totalorder %s1433_s10, %s1602_s2 }
 0x6fc   :  { %p1439_p9 = pnand %p1437_p8, %p1434_p7 }
 0x6fe   :  { %1442 = shalt.err (!%p1439_p9)
}
 0x6ff   :  { %753 = dma.vmem_to_hbm [thread:$0]  %s751_s6, 128, %s1602_s2, [#allocation5]  }
 0x700   :  { %1447 = dma.done.wait [#allocation5], 128  }
 0x701   :  { %1448 = vsyncadd [#allocation5], 4294967168 }
 0x702   :  { %757 = vsyncpa [#allocation4], 1 }
 0x703   :  { %758 = vsyncpa [#allocation7], 1 }
 0x704   :  { %759 = vsyncpa [#allocation5], 1 }

// kernel: tpu_custom_call.1
= control target key start
LH: loop header
LB: loop body
LE: loop exit
PB: predicated region body
PF: predicated region fallthrough
CT: control target
= control target key end

     0   :  { %7 = vsyncpa [#allocation4], 0  ;;  %s1600_s0 = inlined_call_operand.hbm [shape: f32[8,44], index: 0, kind: input, shape index: {}]   ;;  %s1601_s1 = inlined_call_operand.hbm [shape: f32[1024,128], index: 1, kind: input, shape index: {}]   ;;  %s1602_s2 = inlined_call_operand.hbm [shape: f32[8,128], index: 2, kind: output, shape index: {}]  }
   0x1   :  { %8 = vsyncpa [#allocation7], 0 }
   0x2   :  { %9 = vsyncpa [#allocation5], 0  ;;  %s1449_s9 = smov [#allocation3]   ;;  %s1450_s11 = smov [#allocation6]  }
   0x3   :  { %s16_s10 = sshll.u32 %s1449_s9, 4  ;;  %s25_s12 = sshll.u32 %s1450_s11, 4  ;;  %s17_s10 = int_to_ptr.vmem [resolvable:$true] %s16_s10  ;;  %s1472_s12 = int_to_ptr.vmem [resolvable:$true] %s25_s12 }
   0x4   :  { %s1377_s15 = scalar_lea.hbm %s1600_s0, 128 }
   0x5   :  { %p1378_p0 = scmp.ne.s32.totalorder %s1600_s0, %s1377_s15  ;;  %p1381_p1 = scmp.lt.u32.totalorder %s1377_s15, %s1600_s0 }
   0x7   :  { %p1383_p2 = pnand %p1381_p1, %p1378_p0 }
   0x9   :  { %1386 = shalt.err (!%p1383_p2)
}
   0xa   :  { %s1387_s20 = scalar_lea.vmem %s17_s10, 128  ;;  %p1392_p4 = scmp.lt.s32.totalorder %s17_s10, %s17_s10 }
   0xb   :  { %p1388_p3 = scmp.ne.s32.totalorder %s17_s10, %s1387_s20  ;;  %p1393_p5 = scmp.lt.s32.totalorder %s1387_s20, %s1387_s20 }
   0xd   :  { %p1394_p6 = por %p1393_p5, %p1392_p4 }
   0xf   :  { %p1395_p7 = pnand %p1394_p6, %p1388_p3 }
  0x11   :  { %1398 = shalt.err (!%p1395_p7)
}
  0x12   :  { %19 = dma.hbm_to_vmem [thread:$0]  %s1600_s0, 128, %s17_s10, [#allocation4]  }
  0x13   :  { %s1399_s25 = scalar_lea.hbm %s1601_s1, 16384 }
  0x14   :  { %p1400_p8 = scmp.ne.s32.totalorder %s1601_s1, %s1399_s25  ;;  %p1403_p9 = scmp.lt.u32.totalorder %s1399_s25, %s1601_s1 }
  0x16   :  { %p1405_p10 = pnand %p1403_p9, %p1400_p8 }
  0x18   :  { %1408 = shalt.err (!%p1405_p10)
}
  0x19   :  { %s1409_s30 = scalar_lea.vmem %s1472_s12, 16384  ;;  %p1414_p12 = scmp.lt.s32.totalorder %s1472_s12, %s1472_s12 }
  0x1a   :  { %p1410_p11 = scmp.ne.s32.totalorder %s1472_s12, %s1409_s30  ;;  %p1415_p13 = scmp.lt.s32.totalorder %s1409_s30, %s1409_s30 }
  0x1c   :  { %p1416_p0 = por %p1415_p13, %p1414_p12 }
  0x1e   :  { %p1417_p1 = pnand %p1416_p0, %p1410_p11 }
  0x20   :  { %1420 = shalt.err (!%p1417_p1)
}
  0x21   :  { %s1451_s0 = smov 128   ;;  %s1452_s3 = smov 8  }
  0x22   :  { %31 = dma.hbm_to_vmem [thread:$0]  %s1601_s1, 16384, %s1472_s12, [#allocation7], %s1451_s0, %s1451_s0, %s1452_s3  }
  0x23   :  { %1443 = dma.done.wait [#allocation4], 128  }
  0x24   :  { %1444 = vsyncadd [#allocation4], 4294967168 }
  0x25   :  { %1445 = dma.done.wait [#allocation7], 16384  }
  0x26   :  { %1446 = vsyncadd [#allocation7], 4294950912  ;;  %v38_v0 = vlaneseq  ;;  %v1453_v1 = vmov 0.0|0.0   ;;  %vm1454_vm0 = vmmov 0   ;;  %v1455_v2 = vmov 0.0   ;;  %v48_v5 = vld [vmem:[#allocation6] sm:$0xff] }
  0x27   :  { %1177 = vmatprep.subr.bf16.mxu0 %v1453_v1  ;;  %929 = vmatprep.mubr.msk.f32.mxu0 %vm1454_vm0, %v1455_v2  ;;  %v49_v6 = vld [vmem:[#allocation6 + $0x8] sm:$0xff]  ;;  %v50_v7 = vld [vmem:[#allocation6 + $0x10] sm:$0xff]  ;;  %v51_v9 = vld [vmem:[#allocation6 + $0x18] sm:$0xff]  ;;  %vm45_vm2 = vcmask 359424   ;;  %s1456_s1 = smov [#allocation8]  }
  0x28   :  { %v39_v3 = vand.u32 127, %v38_v0  ;;  %1201 = vmatprep.subr.bf16.mxu1 %v1453_v1  ;;  %964 = vmatprep.mubr.msk.f32.mxu1 %vm1454_vm0, %v1455_v2  ;;  %v1178_v8 = vpack.c.bf16 %v49_v6, %v48_v5  ;;  %v1181_v10 = vpack.c.bf16 %v51_v9, %v50_v7  ;;  %v52_v11 = vld [vmem:[#allocation6 + $0x20] sm:$0xff]  ;;  %v53_v12 = vld [vmem:[#allocation6 + $0x28] sm:$0xff]  ;;  %v44_v13 = vld [vmem:[#allocation3] sm:$0xff]  ;;  %s750_s6 = sshll.u32 %s1456_s1, 4  ;;  %s751_s6 = int_to_ptr.vmem [resolvable:$true] %s750_s6 }
  0x29   :  { %v135_v14 = vld [vmem:[#allocation6 + $0x80] sm:$0xff]  ;;  %v136_v15 = vld [vmem:[#allocation6 + $0x88] sm:$0xff]  ;;  %v137_v16 = vld [vmem:[#allocation6 + $0x90] sm:$0xff]  ;;  %v1184_v18 = vpack.c.bf16 %v53_v12, %v52_v11  ;;  %s1421_s7 = scalar_lea.vmem %s751_s6, 128  ;;  %p1426_p3 = scmp.lt.s32.totalorder %s751_s6, %s751_s6 }
  0x2a   :  { %vm40_vm1 = vcmp.eq.s32.totalorder %v39_v3, 127  ;;  %1179 = vmatpush3.bf16.msra.mxu0 %v1178_v8  ;;  %v138_v17 = vld [vmem:[#allocation6 + $0x98] sm:$0xff]  ;;  %v1202_v19 = vpack.c.bf16 %v136_v15, %v135_v14  ;;  %v54_v20 = vld [vmem:[#allocation6 + $0x30] sm:$0xff]  ;;  %v139_v23 = vld [vmem:[#allocation6 + $0xa0] sm:$0xff]  ;;  %p1422_p2 = scmp.ne.s32.totalorder %s751_s6, %s1421_s7  ;;  %p1427_p4 = scmp.lt.s32.totalorder %s1421_s7, %s1421_s7 }
  0x2b   :  { %v760_v4 = vsel %vm40_vm1, 1.0, %v1455_v2  ;;  %1180 = vmatprep.subr.bf16.mxu0 %v1453_v1  ;;  %v55_v21 = vld [vmem:[#allocation6 + $0x38] sm:$0xff]  ;;  %v1205_v22 = vpack.c.bf16 %v138_v17, %v137_v16  ;;  %v140_v24 = vld [vmem:[#allocation6 + $0xa8] sm:$0xff]  ;;  %v56_v26 = vld [vmem:[#allocation6 + $0x40] sm:$0xff] }
  0x2c   :  { %43 = vst [vmem:[#allocation2] sm:$0xff] %v760_v4  ;;  %1203 = vmatpush3.bf16.msra.mxu1 %v1202_v19  ;;  %v1187_v25 = vpack.c.bf16 %v55_v21, %v54_v20  ;;  %v57_v27 = vld [vmem:[#allocation6 + $0x48] sm:$0xff]  ;;  %v1208_v28 = vpack.c.bf16 %v140_v24, %v139_v23  ;;  %v141_v29 = vld [vmem:[#allocation6 + $0xb0] sm:$0xff]  ;;  %v142_v30 = vld [vmem:[#allocation6 + $0xb8] sm:$0xff]  ;;  %p1428_p5 = por %p1427_p4, %p1426_p3 }
  0x2d   :  { %46 = vst.msk [vmem:[#allocation2] sm:$0xff] %vm45_vm2, %v44_v13  ;;  %1204 = vmatprep.subr.bf16.mxu1 %v1453_v1  ;;  %v1190_v31 = vpack.c.bf16 %v57_v27, %v56_v26  ;;  %v58_v32 = vld [vmem:[#allocation6 + $0x50] sm:$0xff]  ;;  %v59_v33 = vld [vmem:[#allocation6 + $0x58] sm:$0xff]  ;;  %v1211_v34 = vpack.c.bf16 %v142_v30, %v141_v29  ;;  %v143_v35 = vld [vmem:[#allocation6 + $0xc0] sm:$0xff] }
  0x2e   :  { %1182 = vmatpush3.bf16.msra.mxu0 %v1181_v10  ;;  %v144_v36 = vld [vmem:[#allocation6 + $0xc8] sm:$0xff]  ;;  %v1193_v37 = vpack.c.bf16 %v59_v33, %v58_v32  ;;  %v60_v38 = vld [vmem:[#allocation6 + $0x60] sm:$0xff]  ;;  %v145_v41 = vld [vmem:[#allocation6 + $0xd0] sm:$0xff]  ;;  %p1429_p6 = pnand %p1428_p5, %p1422_p2 }
  0x2f   :  { %1183 = vmatprep.subr.bf16.mxu0 %v1453_v1  ;;  %v61_v39 = vld [vmem:[#allocation6 + $0x68] sm:$0xff]  ;;  %v1214_v40 = vpack.c.bf16 %v144_v36, %v143_v35  ;;  %v146_v42 = vld [vmem:[#allocation6 + $0xd8] sm:$0xff]  ;;  %v62_v44 = vld [vmem:[#allocation6 + $0x70] sm:$0xff] }
  0x30   :  { %1206 = vmatpush3.bf16.msra.mxu1 %v1205_v22  ;;  %v1196_v43 = vpack.c.bf16 %v61_v39, %v60_v38  ;;  %v63_v45 = vld [vmem:[#allocation6 + $0x78] sm:$0xff]  ;;  %v1217_v46 = vpack.c.bf16 %v146_v42, %v145_v41  ;;  %v147_v47 = vld [vmem:[#allocation6 + $0xe0] sm:$0xff]  ;;  %v148_v48 = vld [vmem:[#allocation6 + $0xe8] sm:$0xff] }
  0x31   :  { %1207 = vmatprep.subr.bf16.mxu1 %v1453_v1  ;;  %v1199_v49 = vpack.c.bf16 %v63_v45, %v62_v44  ;;  %v1220_v50 = vpack.c.bf16 %v148_v48, %v147_v47  ;;  %v149_v52 = vld [vmem:[#allocation6 + $0xf0] sm:$0xff]  ;;  %v150_v53 = vld [vmem:[#allocation6 + $0xf8] sm:$0xff]  ;;  %v222_v55 = vld [vmem:[#allocation6 + $0x100] sm:$0xff] }
  0x32   :  { %1185 = vmatpush3.bf16.msra.mxu0 %v1184_v18  ;;  %v1223_v54 = vpack.c.bf16 %v150_v53, %v149_v52  ;;  %v223_v56 = vld [vmem:[#allocation6 + $0x108] sm:$0xff]  ;;  %v224_v57 = vld [vmem:[#allocation6 + $0x110] sm:$0xff]  ;;  %v225_v59 = vld [vmem:[#allocation6 + $0x118] sm:$0xff] }
  0x33   :  { %1186 = vmatprep.subr.bf16.mxu0 %v1453_v1  ;;  %v1226_v58 = vpack.c.bf16 %v223_v56, %v222_v55  ;;  %v1229_v60 = vpack.c.bf16 %v225_v59, %v224_v57  ;;  %v226_v61 = vld [vmem:[#allocation6 + $0x120] sm:$0xff]  ;;  %v227_v62 = vld [vmem:[#allocation6 + $0x128] sm:$0xff]  ;;  %v228_v0 = vld [vmem:[#allocation6 + $0x130] sm:$0xff] }
  0x34   :  { %1209 = vmatpush3.bf16.msra.mxu1 %v1208_v28  ;;  %v47_v51 = vld [vmem:[#allocation2] sm:$0xff]  ;;  %v1232_v63 = vpack.c.bf16 %v227_v62, %v226_v61  ;;  %v229_v3 = vld [vmem:[#allocation6 + $0x138] sm:$0xff]  ;;  %v230_v5 = vld [vmem:[#allocation6 + $0x140] sm:$0xff] }
  0x35   :  { %1210 = vmatprep.subr.bf16.mxu1 %v1453_v1  ;;  %v1235_v4 = vpack.c.bf16 %v229_v3, %v228_v0  ;;  %v231_v6 = vld [vmem:[#allocation6 + $0x148] sm:$0xff]  ;;  %v232_v8 = vld [vmem:[#allocation6 + $0x150] sm:$0xff]  ;;  %v233_v9 = vld [vmem:[#allocation6 + $0x158] sm:$0xff] }
  0x36   :  { %1188 = vmatpush3.bf16.msra.mxu0 %v1187_v25  ;;  %v1238_v7 = vpack.c.bf16 %v231_v6, %v230_v5  ;;  %v1241_v10 = vpack.c.bf16 %v233_v9, %v232_v8  ;;  %v234_v11 = vld [vmem:[#allocation6 + $0x160] sm:$0xff]  ;;  %v235_v12 = vld [vmem:[#allocation6 + $0x168] sm:$0xff]  ;;  %v236_v17 = vld [vmem:[#allocation6 + $0x170] sm:$0xff] }
  0x37   :  { %1189 = vmatprep.subr.bf16.mxu0 %v1453_v1  ;;  %v1244_v13 = vpack.c.bf16 %v235_v12, %v234_v11  ;;  %v237_v18 = vld [vmem:[#allocation6 + $0x178] sm:$0xff]  ;;  %v309_v20 = vld [vmem:[#allocation6 + $0x180] sm:$0xff]  ;;  %v310_v21 = vld [vmem:[#allocation6 + $0x188] sm:$0xff] }
  0x38   :  { %1212 = vmatpush3.bf16.msra.mxu1 %v1211_v34  ;;  %v1247_v19 = vpack.c.bf16 %v237_v18, %v236_v17  ;;  %v311_v22 = vld [vmem:[#allocation6 + $0x190] sm:$0xff]  ;;  %v1250_v23 = vpack.c.bf16 %v310_v21, %v309_v20  ;;  %v312_v24 = vld [vmem:[#allocation6 + $0x198] sm:$0xff]  ;;  %v313_v26 = vld [vmem:[#allocation6 + $0x1a0] sm:$0xff] }
  0x39   :  { %1213 = vmatprep.subr.bf16.mxu1 %v1453_v1  ;;  %v1253_v25 = vpack.c.bf16 %v312_v24, %v311_v22  ;;  %v314_v27 = vld [vmem:[#allocation6 + $0x1a8] sm:$0xff]  ;;  %v315_v29 = vld [vmem:[#allocation6 + $0x1b0] sm:$0xff]  ;;  %v316_v30 = vld [vmem:[#allocation6 + $0x1b8] sm:$0xff] }
  0x3a   :  { %1191 = vmatpush3.bf16.msra.mxu0 %v1190_v31  ;;  %v1256_v28 = vpack.c.bf16 %v314_v27, %v313_v26  ;;  %v1259_v31 = vpack.c.bf16 %v316_v30, %v315_v29  ;;  %v317_v32 = vld [vmem:[#allocation6 + $0x1c0] sm:$0xff]  ;;  %v318_v33 = vld [vmem:[#allocation6 + $0x1c8] sm:$0xff]  ;;  %v319_v35 = vld [vmem:[#allocation6 + $0x1d0] sm:$0xff] }
  0x3b   :  { %1192 = vmatprep.subr.bf16.mxu0 %v1453_v1  ;;  %v1262_v34 = vpack.c.bf16 %v318_v33, %v317_v32  ;;  %v320_v36 = vld [vmem:[#allocation6 + $0x1d8] sm:$0xff]  ;;  %v321_v38 = vld [vmem:[#allocation6 + $0x1e0] sm:$0xff]  ;;  %v322_v39 = vld [vmem:[#allocation6 + $0x1e8] sm:$0xff] }
  0x3c   :  { %1215 = vmatpush3.bf16.msra.mxu1 %v1214_v40  ;;  %v1268_v40 = vpack.c.bf16 %v322_v39, %v321_v38  ;;  %v323_v44 = vld [vmem:[#allocation6 + $0x1f0] sm:$0xff]  ;;  %v324_v45 = vld [vmem:[#allocation6 + $0x1f8] sm:$0xff]  ;;  %v395_v47 = vld [vmem:[#allocation6 + $0x200] sm:$0xff] }
  0x3d   :  { %1216 = vmatprep.subr.bf16.mxu1 %v1453_v1  ;;  %v396_v48 = vld [vmem:[#allocation6 + $0x208] sm:$0xff]  ;;  %v399_v53 = vld [vmem:[#allocation6 + $0x220] sm:$0xff]  ;;  %v401_v56 = vld [vmem:[#allocation6 + $0x230] sm:$0xff] }
  0x3e   :  { %1194 = vmatpush3.bf16.msra.mxu0 %v1193_v37  ;;  %v1265_v37 = vpack.c.bf16 %v320_v36, %v319_v35  ;;  %v402_v57 = vld [vmem:[#allocation6 + $0x238] sm:$0xff]  ;;  %v403_v59 = vld [vmem:[#allocation6 + $0x240] sm:$0xff]  ;;  %v405_v62 = vld [vmem:[#allocation6 + $0x250] sm:$0xff] }
  0x3f   :  { %1195 = vmatprep.subr.bf16.mxu0 %v1453_v1  ;;  %v407_v3 = vld [vmem:[#allocation6 + $0x260] sm:$0xff]  ;;  %v409_v6 = vld [vmem:[#allocation6 + $0x270] sm:$0xff]  ;;  %v489_v22 = vld [vmem:[#allocation6 + $0x2b8] sm:$0xff] }
  0x40   :  { %1218 = vmatpush3.bf16.msra.mxu1 %v1217_v46  ;;  %v1271_v46 = vpack.c.bf16 %v324_v45, %v323_v44  ;;  %v482_v12 = vld [vmem:[#allocation6 + $0x280] sm:$0xff]  ;;  %v488_v21 = vld [vmem:[#allocation6 + $0x2b0] sm:$0xff]  ;;  %v497_v36 = vld [vmem:[#allocation6 + $0x2f8] sm:$0xff] }
  0x41   :  { %1219 = vmatprep.subr.bf16.mxu1 %v1453_v1  ;;  %v486_v18 = vld [vmem:[#allocation6 + $0x2a0] sm:$0xff]  ;;  %v492_v27 = vld [vmem:[#allocation6 + $0x2d0] sm:$0xff]  ;;  %v570_v39 = vld [vmem:[#allocation6 + $0x308] sm:$0xff] }
  0x42   :  { %1197 = vmatpush3.bf16.msra.mxu0 %v1196_v43  ;;  %v490_v24 = vld [vmem:[#allocation6 + $0x2c0] sm:$0xff]  ;;  %v496_v35 = vld [vmem:[#allocation6 + $0x2f0] sm:$0xff]  ;;  %v574_v45 = vld [vmem:[#allocation6 + $0x328] sm:$0xff] }
  0x43   :  { %1198 = vmatprep.subr.bf16.mxu0 %v1453_v1  ;;  %v494_v30 = vld [vmem:[#allocation6 + $0x2e0] sm:$0xff] }
  0x44   :  { %1221 = vmatpush3.bf16.msra.mxu1 %v1220_v50  ;;  %v1274_v50 = vpack.c.bf16 %v396_v48, %v395_v47  ;;  %v569_v38 = vld [vmem:[#allocation6 + $0x300] sm:$0xff]  ;;  %v575_v47 = vld [vmem:[#allocation6 + $0x330] sm:$0xff]  ;;  %v576_v48 = vld [vmem:[#allocation6 + $0x338] sm:$0xff] }
  0x45   :  { %1222 = vmatprep.subr.bf16.mxu1 %v1453_v1  ;;  %v573_v44 = vld [vmem:[#allocation6 + $0x320] sm:$0xff] }
  0x46   :  { %1200 = vmatpush3.bf16.msra.mxu0 %v1199_v49  ;;  %v397_v49 = vld [vmem:[#allocation6 + $0x210] sm:$0xff] }
  0x47   :  { %1225 = vmatprep.subr.bf16.mxu0 %v1453_v1 }
  0x48   :  { %1224 = vmatpush3.bf16.msra.mxu1 %v1223_v54  ;;  %v400_v54 = vld [vmem:[#allocation6 + $0x228] sm:$0xff] }
  0x49   :  { %930 = vmatmul.mubr.f32.vlgmr.msra.gmra.mrb[0].mxu0 %v47_v51  ;;  %1249 = vmatprep.subr.bf16.mxu1 %v1453_v1  ;;  %v398_v51 = vld [vmem:[#allocation6 + $0x218] sm:$0xff]  ;;  %v1280_v55 = vpack.c.bf16 %v400_v54, %v399_v53  ;;  %v579_v53 = vld [vmem:[#allocation6 + $0x350] sm:$0xff] }
  0x4a   :  { %999 = vmatprep.mubr.msk.f32.mxu0 %vm1454_vm0, %v1455_v2  ;;  %1227 = vmatpush3.bf16.msra.mxu0 %v1226_v58  ;;  %v1277_v52 = vpack.c.bf16 %v398_v51, %v397_v49  ;;  %v1283_v58 = vpack.c.bf16 %v402_v57, %v401_v56  ;;  %v1331_v49 = vpack.c.bf16 %v576_v48, %v575_v47  ;;  %v578_v51 = vld [vmem:[#allocation6 + $0x348] sm:$0xff]  ;;  %v580_v54 = vld [vmem:[#allocation6 + $0x358] sm:$0xff]  ;;  %v581_v56 = vld [vmem:[#allocation6 + $0x360] sm:$0xff] }
  0x4b   :  { %1228 = vmatprep.subr.bf16.mxu0 %v1453_v1  ;;  %v582_v57 = vld [vmem:[#allocation6 + $0x368] sm:$0xff] }
  0x4e   :  { %1230 = vmatpush3.bf16.msra.mxu0 %v1229_v60  ;;  %v404_v60 = vld [vmem:[#allocation6 + $0x248] sm:$0xff] }
  0x4f   :  { %1231 = vmatprep.subr.bf16.mxu0 %v1453_v1  ;;  %v1286_v61 = vpack.c.bf16 %v404_v60, %v403_v59 }
  0x52   :  { %1233 = vmatpush3.bf16.msra.mxu0 %v1232_v63  ;;  %v406_v63 = vld [vmem:[#allocation6 + $0x258] sm:$0xff] }
  0x53   :  { %1234 = vmatprep.subr.bf16.mxu0 %v1453_v1  ;;  %v1289_v0 = vpack.c.bf16 %v406_v63, %v405_v62  ;;  %v583_v62 = vld [vmem:[#allocation6 + $0x370] sm:$0xff]  ;;  %v584_v63 = vld [vmem:[#allocation6 + $0x378] sm:$0xff] }
  0x56   :  { %1236 = vmatpush3.bf16.msra.mxu0 %v1235_v4  ;;  %v408_v4 = vld [vmem:[#allocation6 + $0x268] sm:$0xff] }
  0x57   :  { %1237 = vmatprep.subr.bf16.mxu0 %v1453_v1  ;;  %v1292_v5 = vpack.c.bf16 %v408_v4, %v407_v3  ;;  %v656_v3 = vld [vmem:[#allocation6 + $0x380] sm:$0xff]  ;;  %v657_v4 = vld [vmem:[#allocation6 + $0x388] sm:$0xff] }
  0x5a   :  { %1239 = vmatpush3.bf16.msra.mxu0 %v1238_v7  ;;  %v410_v7 = vld [vmem:[#allocation6 + $0x278] sm:$0xff] }
  0x5b   :  { %1240 = vmatprep.subr.bf16.mxu0 %v1453_v1  ;;  %v1295_v8 = vpack.c.bf16 %v410_v7, %v409_v6  ;;  %v1346_v6 = vpack.c.bf16 %v657_v4, %v656_v3  ;;  %v659_v7 = vld [vmem:[#allocation6 + $0x398] sm:$0xff] }
  0x5e   :  { %1242 = vmatpush3.bf16.msra.mxu0 %v1241_v10 }
  0x5f   :  { %1243 = vmatprep.subr.bf16.mxu0 %v1453_v1 }
  0x62   :  { %1245 = vmatpush3.bf16.msra.mxu0 %v1244_v13  ;;  %v483_v13 = vld [vmem:[#allocation6 + $0x288] sm:$0xff] }
  0x63   :  { %1246 = vmatprep.subr.bf16.mxu0 %v1453_v1 }
  0x66   :  { %1248 = vmatpush3.bf16.msra.mxu0 %v1247_v19  ;;  %v487_v19 = vld [vmem:[#allocation6 + $0x2a8] sm:$0xff] }
  0x67   :  { %1273 = vmatprep.subr.bf16.mxu0 %v1453_v1  ;;  %v1304_v20 = vpack.c.bf16 %v487_v19, %v486_v18  ;;  %v667_v18 = vld [vmem:[#allocation6 + $0x3d8] sm:$0xff] }
 0x11c   :  { %v130_v14 = vpop.f32.mrb[0].mxu0 }
 0x11d   :  { %v134_v15 = vmax.f32 %v130_v14, 0.0  ;;  %v931_v16 = vpop.f32.mrb[1].mxu0  ;;  %v484_v14 = vld [vmem:[#allocation6 + $0x290] sm:$0xff] }
 0x11e   :  { %v485_v16 = vld [vmem:[#allocation6 + $0x298] sm:$0xff] }
 0x11f   :  { %965 = vmatmul.mubr.f32.vlgmr.msra.gmra.mrb[0].mxu1 %v134_v15  ;;  %v1298_v15 = vpack.c.bf16 %v483_v13, %v482_v12  ;;  %v1301_v17 = vpack.c.bf16 %v485_v16, %v484_v14  ;;  %v663_v12 = vld [vmem:[#allocation6 + $0x3b8] sm:$0xff]  ;;  %v664_v14 = vld [vmem:[#allocation6 + $0x3c0] sm:$0xff] }
 0x120   :  { %1034 = vmatprep.mubr.msk.f32.mxu1 %vm1454_vm0, %v1455_v2  ;;  %1251 = vmatpush3.bf16.msra.mxu1 %v1250_v23  ;;  %v1307_v23 = vpack.c.bf16 %v489_v22, %v488_v21  ;;  %v669_v21 = vld [vmem:[#allocation6 + $0x3e8] sm:$0xff] }
 0x121   :  { %1252 = vmatprep.subr.bf16.mxu1 %v1453_v1 }
 0x124   :  { %1254 = vmatpush3.bf16.msra.mxu1 %v1253_v25  ;;  %v491_v25 = vld [vmem:[#allocation6 + $0x2c8] sm:$0xff] }
 0x125   :  { %1255 = vmatprep.subr.bf16.mxu1 %v1453_v1  ;;  %v1310_v26 = vpack.c.bf16 %v491_v25, %v490_v24 }
 0x128   :  { %1257 = vmatpush3.bf16.msra.mxu1 %v1256_v28  ;;  %v493_v28 = vld [vmem:[#allocation6 + $0x2d8] sm:$0xff] }
 0x129   :  { %1258 = vmatprep.subr.bf16.mxu1 %v1453_v1  ;;  %v1313_v29 = vpack.c.bf16 %v493_v28, %v492_v27  ;;  %v671_v27 = vld [vmem:[#allocation6 + $0x3f8] sm:$0xff] }
 0x12c   :  { %1260 = vmatpush3.bf16.msra.mxu1 %v1259_v31  ;;  %v495_v31 = vld [vmem:[#allocation6 + $0x2e8] sm:$0xff] }
 0x12d   :  { %1261 = vmatprep.subr.bf16.mxu1 %v1453_v1  ;;  %v1316_v32 = vpack.c.bf16 %v495_v31, %v494_v30 }
 0x130   :  { %1263 = vmatpush3.bf16.msra.mxu1 %v1262_v34 }
 0x131   :  { %1264 = vmatprep.subr.bf16.mxu1 %v1453_v1 }
 0x134   :  { %1266 = vmatpush3.bf16.msra.mxu1 %v1265_v37  ;;  %v1319_v37 = vpack.c.bf16 %v497_v36, %v496_v35 }
 0x135   :  { %1267 = vmatprep.subr.bf16.mxu1 %v1453_v1 }
 0x138   :  { %1269 = vmatpush3.bf16.msra.mxu1 %v1268_v40  ;;  %v571_v40 = vld [vmem:[#allocation6 + $0x310] sm:$0xff] }
 0x139   :  { %1270 = vmatprep.subr.bf16.mxu1 %v1453_v1 }
 0x13c   :  { %1272 = vmatpush3.bf16.msra.mxu1 %v1271_v46  ;;  %v1328_v46 = vpack.c.bf16 %v574_v45, %v573_v44 }
 0x13d   :  { %1297 = vmatprep.subr.bf16.mxu1 %v1453_v1 }
 0x1f2   :  { %v217_v41 = vpop.f32.mrb[0].mxu1 }
 0x1f3   :  { %v221_v42 = vmax.f32 %v217_v41, 0.0  ;;  %v966_v43 = vpop.f32.mrb[1].mxu1  ;;  %v1322_v41 = vpack.c.bf16 %v570_v39, %v569_v38 }
 0x1f5   :  { %1000 = vmatmul.mubr.f32.vlgmr.msra.gmra.mrb[2].mxu0 %v221_v42  ;;  %v572_v42 = vld [vmem:[#allocation6 + $0x318] sm:$0xff] }
 0x1f6   :  { %1069 = vmatprep.mubr.msk.f32.mxu0 %vm1454_vm0, %v1455_v2  ;;  %1275 = vmatpush3.bf16.msra.mxu0 %v1274_v50  ;;  %v1325_v43 = vpack.c.bf16 %v572_v42, %v571_v40  ;;  %v577_v50 = vld [vmem:[#allocation6 + $0x340] sm:$0xff] }
 0x1f7   :  { %1276 = vmatprep.subr.bf16.mxu0 %v1453_v1 }
 0x1fa   :  { %1278 = vmatpush3.bf16.msra.mxu0 %v1277_v52  ;;  %v1334_v52 = vpack.c.bf16 %v578_v51, %v577_v50 }
 0x1fb   :  { %1279 = vmatprep.subr.bf16.mxu0 %v1453_v1 }
 0x1fe   :  { %1281 = vmatpush3.bf16.msra.mxu0 %v1280_v55  ;;  %v1337_v55 = vpack.c.bf16 %v580_v54, %v579_v53 }
 0x1ff   :  { %1282 = vmatprep.subr.bf16.mxu0 %v1453_v1 }
 0x202   :  { %1284 = vmatpush3.bf16.msra.mxu0 %v1283_v58  ;;  %v1340_v58 = vpack.c.bf16 %v582_v57, %v581_v56 }
 0x203   :  { %1285 = vmatprep.subr.bf16.mxu0 %v1453_v1 }
 0x206   :  { %1287 = vmatpush3.bf16.msra.mxu0 %v1286_v61 }
 0x207   :  { %1288 = vmatprep.subr.bf16.mxu0 %v1453_v1 }
 0x20a   :  { %1290 = vmatpush3.bf16.msra.mxu0 %v1289_v0  ;;  %v1343_v0 = vpack.c.bf16 %v584_v63, %v583_v62 }
 0x20b   :  { %1291 = vmatprep.subr.bf16.mxu0 %v1453_v1 }
 0x20e   :  { %1293 = vmatpush3.bf16.msra.mxu0 %v1292_v5  ;;  %v658_v5 = vld [vmem:[#allocation6 + $0x390] sm:$0xff] }
 0x20f   :  { %1294 = vmatprep.subr.bf16.mxu0 %v1453_v1 }
 0x212   :  { %1296 = vmatpush3.bf16.msra.mxu0 %v1295_v8  ;;  %v1349_v8 = vpack.c.bf16 %v659_v7, %v658_v5 }
 0x213   :  { %1321 = vmatprep.subr.bf16.mxu0 %v1453_v1 }
 0x2c8   :  { %v304_v9 = vpop.f32.mrb[2].mxu0 }
 0x2c9   :  { %v308_v10 = vmax.f32 %v304_v9, 0.0  ;;  %v1001_v11 = vpop.f32.mrb[3].mxu0  ;;  %v660_v9 = vld [vmem:[#allocation6 + $0x3a0] sm:$0xff] }
 0x2cb   :  { %1035 = vmatmul.mubr.f32.vlgmr.msra.gmra.mrb[2].mxu1 %v308_v10  ;;  %v661_v10 = vld [vmem:[#allocation6 + $0x3a8] sm:$0xff] }
 0x2cc   :  { %1104 = vmatprep.mubr.msk.f32.mxu1 %vm1454_vm0, %v1455_v2  ;;  %1299 = vmatpush3.bf16.msra.mxu1 %v1298_v15  ;;  %v1352_v11 = vpack.c.bf16 %v661_v10, %v660_v9  ;;  %v665_v15 = vld [vmem:[#allocation6 + $0x3c8] sm:$0xff] }
 0x2cd   :  { %1300 = vmatprep.subr.bf16.mxu1 %v1453_v1  ;;  %v1358_v16 = vpack.c.bf16 %v665_v15, %v664_v14 }
 0x2d0   :  { %1302 = vmatpush3.bf16.msra.mxu1 %v1301_v17  ;;  %v666_v17 = vld [vmem:[#allocation6 + $0x3d0] sm:$0xff] }
 0x2d1   :  { %1303 = vmatprep.subr.bf16.mxu1 %v1453_v1  ;;  %v1361_v19 = vpack.c.bf16 %v667_v18, %v666_v17 }
 0x2d4   :  { %1305 = vmatpush3.bf16.msra.mxu1 %v1304_v20  ;;  %v668_v20 = vld [vmem:[#allocation6 + $0x3e0] sm:$0xff] }
 0x2d5   :  { %1306 = vmatprep.subr.bf16.mxu1 %v1453_v1  ;;  %v1364_v22 = vpack.c.bf16 %v669_v21, %v668_v20 }
 0x2d8   :  { %1308 = vmatpush3.bf16.msra.mxu1 %v1307_v23 }
 0x2d9   :  { %1309 = vmatprep.subr.bf16.mxu1 %v1453_v1 }
 0x2dc   :  { %1311 = vmatpush3.bf16.msra.mxu1 %v1310_v26  ;;  %v670_v26 = vld [vmem:[#allocation6 + $0x3f0] sm:$0xff] }
 0x2dd   :  { %1312 = vmatprep.subr.bf16.mxu1 %v1453_v1  ;;  %v1367_v28 = vpack.c.bf16 %v671_v27, %v670_v26 }
 0x2e0   :  { %1314 = vmatpush3.bf16.msra.mxu1 %v1313_v29 }
 0x2e1   :  { %1315 = vmatprep.subr.bf16.mxu1 %v1453_v1 }
 0x2e4   :  { %1317 = vmatpush3.bf16.msra.mxu1 %v1316_v32 }
 0x2e5   :  { %1318 = vmatprep.subr.bf16.mxu1 %v1453_v1 }
 0x2e8   :  { %1320 = vmatpush3.bf16.msra.mxu1 %v1319_v37 }
 0x2e9   :  { %1345 = vmatprep.subr.bf16.mxu1 %v1453_v1 }
 0x39e   :  { %v1565_v33 = vpop.f32.mrb[2].mxu1 }
 0x39f   :  { %v1036_v34 = vpop.f32.mrb[3].mxu1  ;;  %1070 = vmatmul.mubr.f32.vlgmr.msra.gmra.mrb[4].mxu0 %v1565_v33 }
 0x3a0   :  { %1139 = vmatprep.mubr.msk.f32.mxu0 %vm1454_vm0, %v1455_v2  ;;  %1323 = vmatpush3.bf16.msra.mxu0 %v1322_v41 }
 0x3a1   :  { %1324 = vmatprep.subr.bf16.mxu0 %v1453_v1 }
 0x3a4   :  { %1326 = vmatpush3.bf16.msra.mxu0 %v1325_v43 }
 0x3a5   :  { %1327 = vmatprep.subr.bf16.mxu0 %v1453_v1 }
 0x3a8   :  { %1329 = vmatpush3.bf16.msra.mxu0 %v1328_v46 }
 0x3a9   :  { %1330 = vmatprep.subr.bf16.mxu0 %v1453_v1 }
 0x3ac   :  { %1332 = vmatpush3.bf16.msra.mxu0 %v1331_v49 }
 0x3ad   :  { %1333 = vmatprep.subr.bf16.mxu0 %v1453_v1 }
 0x3b0   :  { %1335 = vmatpush3.bf16.msra.mxu0 %v1334_v52 }
 0x3b1   :  { %1336 = vmatprep.subr.bf16.mxu0 %v1453_v1 }
 0x3b4   :  { %1338 = vmatpush3.bf16.msra.mxu0 %v1337_v55 }
 0x3b5   :  { %1339 = vmatprep.subr.bf16.mxu0 %v1453_v1 }
 0x3b8   :  { %1341 = vmatpush3.bf16.msra.mxu0 %v1340_v58 }
 0x3b9   :  { %1342 = vmatprep.subr.bf16.mxu0 %v1453_v1 }
 0x3bc   :  { %1344 = vmatpush3.bf16.msra.mxu0 %v1343_v0 }
 0x472   :  { %v477_v59 = vpop.f32.mrb[4].mxu0 }
 0x473   :  { %v481_v60 = vmax.f32 %v477_v59, 0.0  ;;  %v1071_v61 = vpop.f32.mrb[5].mxu0 }
 0x475   :  { %1105 = vmatmul.mubr.f32.vlgmr.msra.gmra.mrb[4].mxu1 %v481_v60 }
 0x476   :  { %1174 = vmatprep.mubr.msk.f32.mxu1 %vm1454_vm0, %v1455_v2  ;;  %1347 = vmatpush3.bf16.msra.mxu1 %v1346_v6  ;;  %v662_v2 = vld [vmem:[#allocation6 + $0x3b0] sm:$0xff] }
 0x477   :  { %1348 = vmatprep.subr.bf16.mxu1 %v1453_v1  ;;  %v1355_v13 = vpack.c.bf16 %v663_v12, %v662_v2 }
 0x47a   :  { %1350 = vmatpush3.bf16.msra.mxu1 %v1349_v8 }
 0x47b   :  { %1351 = vmatprep.subr.bf16.mxu1 %v1453_v1 }
 0x47e   :  { %1353 = vmatpush3.bf16.msra.mxu1 %v1352_v11 }
 0x47f   :  { %1354 = vmatprep.subr.bf16.mxu1 %v1453_v1 }
 0x482   :  { %1356 = vmatpush3.bf16.msra.mxu1 %v1355_v13 }
 0x483   :  { %1357 = vmatprep.subr.bf16.mxu1 %v1453_v1 }
 0x486   :  { %1359 = vmatpush3.bf16.msra.mxu1 %v1358_v16 }
 0x487   :  { %1360 = vmatprep.subr.bf16.mxu1 %v1453_v1 }
 0x48a   :  { %1362 = vmatpush3.bf16.msra.mxu1 %v1361_v19 }
 0x48b   :  { %1363 = vmatprep.subr.bf16.mxu1 %v1453_v1 }
 0x48e   :  { %1365 = vmatpush3.bf16.msra.mxu1 %v1364_v22 }
 0x48f   :  { %1366 = vmatprep.subr.bf16.mxu1 %v1453_v1 }
 0x492   :  { %1368 = vmatpush3.bf16.msra.mxu1 %v1367_v28 }
 0x548   :  { %v564_v23 = vpop.f32.mrb[4].mxu1 }
 0x549   :  { %v568_v24 = vmax.f32 %v564_v23, 0.0  ;;  %v1106_v25 = vpop.f32.mrb[5].mxu1 }
 0x54b   :  { %1140 = vmatmul.mubr.f32.vlgmr.msra.gmra.mrb[6].mxu0 %v568_v24 }
 0x61e   :  { %v651_v29 = vpop.f32.mrb[6].mxu0 }
 0x61f   :  { %v655_v30 = vmax.f32 %v651_v29, 0.0  ;;  %v1141_v31 = vpop.f32.mrb[7].mxu0 }
 0x621   :  { %1175 = vmatmul.mubr.f32.vlgmr.msra.gmra.mrb[6].mxu1 %v655_v30 }
 0x6f4   :  { %v738_v32 = vpop.f32.mrb[6].mxu1 }
 0x6f5   :  { %v742_v34 = vadd.f32 %v738_v32, %v1565_v33  ;;  %v1176_v35 = vpop.f32.mrb[7].mxu1 }
 0x6f7   :  { %743 = vst [vmem:[#allocation8] sm:$0xff] %v742_v34 }
 0x6f8   :  { %1432 = shalt.err (!%p1429_p6)
}
 0x6f9   :  { %s1433_s10 = scalar_lea.hbm %s1602_s2, 128 }
 0x6fa   :  { %p1434_p7 = scmp.ne.s32.totalorder %s1602_s2, %s1433_s10  ;;  %p1437_p8 = scmp.lt.u32.totalorder %s1433_s10, %s1602_s2 }
 0x6fc   :  { %p1439_p9 = pnand %p1437_p8, %p1434_p7 }
 0x6fe   :  { %1442 = shalt.err (!%p1439_p9)
}
 0x6ff   :  { %753 = dma.vmem_to_hbm [thread:$0]  %s751_s6, 128, %s1602_s2, [#allocation5]  }
 0x700   :  { %1447 = dma.done.wait [#allocation5], 128  }
 0x701   :  { %1448 = vsyncadd [#allocation5], 4294967168 }
 0x702   :  { %757 = vsyncpa [#allocation4], 1 }
 0x703   :  { %758 = vsyncpa [#allocation7], 1 }
 0x704   :  { %759 = vsyncpa [#allocation5], 1 }

</bundles_post_ra>
